<compile_context>
chip_gen: v7x
topology: tpu7x:2x2x1
jax: 0.10.0
libtpu: 0.0.40
codegen_flags: <defaults>
</compile_context>

<pallas_src>
import jax
import jax.numpy as jnp
from jax.experimental import pallas as pl
from jax.experimental.pallas import tpu as pltpu

LANE = 128       # vreg lane width
SUBLANE = 8      # vreg sublane count
FUSED_VMEM_BUDGET = 36 * 1024 * 1024   # sized against v7x's 64 MiB VMEM


def _round_up(x, m):
    return ((x + m - 1) // m) * m


def _pick_tile(num_nodes):
    """Row/K tile for the padded node axis: >=2 blocks (v7x megacore), <=1024."""
    half = _round_up(max(num_nodes // 2, SUBLANE), SUBLANE)
    return min(1024, half)


def _tile_for_pad(n_pad):
    """Largest power-of-two-ish tile that divides n_pad with >= 2 blocks."""
    for t in (1024, 512, 256, 128, 64, 32, 16, 8):
        if n_pad % t == 0 and n_pad // t >= 2:
            return t
    return n_pad


def _fused_vmem_bytes(n_pad, f, h_pad, fc_pad, o_pad, b_pad):
    a = 2 * n_pad * n_pad                                   # A_hat bf16 resident
    acts = 6 * 4 * n_pad * h_pad                            # f32 intermediates
    x = 2 * n_pad * f
    w = 2 * (f * h_pad + h_pad * h_pad + h_pad * fc_pad + fc_pad * o_pad)
    p = 2 * b_pad * n_pad
    return a + acts + x + w + p


# ----------------------------- kernels ---------------------------------------

def fused_forward_kernel(a_ref, x_ref, w1_ref, b1_ref, w2_ref, b2_ref,
                         p_ref, wf1_ref, bf1_ref, wf2_ref, bf2_ref, o_ref):
    """Whole forward in one kernel; A_hat resident in VMEM, read once."""
    a = a_ref[...]                                          # bf16 (n_pad, n_pad)

    # GCNConv 1
    t1 = jnp.dot(x_ref[...], w1_ref[...],
                 preferred_element_type=jnp.float32)
    h1 = jnp.maximum(jnp.dot(a, t1.astype(jnp.bfloat16),
                             preferred_element_type=jnp.float32)
                     + b1_ref[...], 0.0)
    # F.dropout(training=False) -> identity.

    # GCNConv 2
    t2 = jnp.dot(h1.astype(jnp.bfloat16), w2_ref[...],
                 preferred_element_type=jnp.float32)
    h2 = jnp.maximum(jnp.dot(a, t2.astype(jnp.bfloat16),
                             preferred_element_type=jnp.float32)
                     + b2_ref[...], 0.0)

    # global_add_pool + fc_block
    g = jnp.dot(p_ref[...], h2.astype(jnp.bfloat16),
                preferred_element_type=jnp.float32)
    z = jnp.maximum(jnp.dot(g.astype(jnp.bfloat16), wf1_ref[...],
                            preferred_element_type=jnp.float32)
                    + bf1_ref[...], 0.0)
    o_ref[...] = (jnp.dot(z.astype(jnp.bfloat16), wf2_ref[...],
                          preferred_element_type=jnp.float32) + bf2_ref[...])


def gcn_layer_kernel(a_ref, x_ref, w_ref, b_ref, o_ref, acc_ref):
    """One GCN layer, K-tiled: H = relu(A @ (X @ W) + b); transform fused."""
    k = pl.program_id(1)

    @pl.when(k == 0)
    def _():
        acc_ref[...] = jnp.zeros_like(acc_ref)

    # Transform for this K-slab, computed on the fly (no HBM intermediate).
    t = jnp.dot(x_ref[...], w_ref[...],
                preferred_element_type=jnp.float32).astype(jnp.bfloat16)
    acc_ref[...] += jnp.dot(a_ref[...], t, preferred_element_type=jnp.float32)

    @pl.when(k == pl.num_programs(1) - 1)
    def _():
        o_ref[...] = jnp.maximum(acc_ref[...] + b_ref[...],
                                 0.0).astype(o_ref.dtype)


def pool_fc_kernel(p_ref, h_ref, wf1_ref, bf1_ref, wf2_ref, bf2_ref,
                   o_ref, acc_ref):
    """g = P @ H (K-tiled over nodes); fused fc_block on the final step."""
    k = pl.program_id(0)

    @pl.when(k == 0)
    def _():
        acc_ref[...] = jnp.zeros_like(acc_ref)

    acc_ref[...] += jnp.dot(p_ref[...], h_ref[...],
                            preferred_element_type=jnp.float32)

    @pl.when(k == pl.num_programs(0) - 1)
    def _():
        g = acc_ref[...].astype(jnp.bfloat16)
        z = jnp.dot(g, wf1_ref[...],
                    preferred_element_type=jnp.float32) + bf1_ref[...]
        z = jnp.maximum(z, 0.0).astype(jnp.bfloat16)
        # Dropout(training=False) -> identity.
        o_ref[...] = (jnp.dot(z, wf2_ref[...],
                              preferred_element_type=jnp.float32)
                      + bf2_ref[...])


# -------------------------- pallas_call wrappers ------------------------------

def _gcn_layer(a, x, w, b, tile):
    n_pad = a.shape[0]
    f = x.shape[1]
    h_pad = w.shape[1]
    n_row_tiles = n_pad // tile
    return pl.pallas_call(
        gcn_layer_kernel,
        out_shape=jax.ShapeDtypeStruct((n_pad, h_pad), jnp.bfloat16),
        grid_spec=pltpu.PrefetchScalarGridSpec(
            num_scalar_prefetch=0,
            grid=(n_row_tiles, n_pad // tile),
            in_specs=[pl.BlockSpec((tile, tile), lambda i, k: (i, k)),
                      pl.BlockSpec((tile, f), lambda i, k: (k, 0)),
                      pl.BlockSpec((f, h_pad), lambda i, k: (0, 0)),
                      pl.BlockSpec((1, h_pad), lambda i, k: (0, 0))],
            out_specs=pl.BlockSpec((tile, h_pad), lambda i, k: (i, 0)),
            scratch_shapes=[pltpu.VMEM((tile, h_pad), jnp.float32)],
        ),
        compiler_params=pltpu.CompilerParams(
            dimension_semantics=("parallel", "arbitrary")),
        cost_estimate=pl.CostEstimate(
            flops=2 * n_pad * n_pad * h_pad
                  + 2 * n_pad * f * h_pad * n_row_tiles,
            transcendentals=0,
            bytes_accessed=2 * n_pad * n_pad
                           + 2 * n_pad * f * n_row_tiles
                           + 2 * n_pad * h_pad),
    )(a, x, w, b)


def _pool_fc(p, h, wf1, bf1, wf2, bf2, tile_k):
    b_pad, n_pad = p.shape
    h_pad = h.shape[1]
    fc_pad = wf1.shape[1]
    o_pad = wf2.shape[1]
    return pl.pallas_call(
        pool_fc_kernel,
        out_shape=jax.ShapeDtypeStruct((b_pad, o_pad), jnp.float32),
        grid_spec=pltpu.PrefetchScalarGridSpec(
            num_scalar_prefetch=0,
            grid=(n_pad // tile_k,),
            in_specs=[pl.BlockSpec((b_pad, tile_k), lambda k: (0, k)),
                      pl.BlockSpec((tile_k, h_pad), lambda k: (k, 0)),
                      pl.BlockSpec((h_pad, fc_pad), lambda k: (0, 0)),
                      pl.BlockSpec((1, fc_pad), lambda k: (0, 0)),
                      pl.BlockSpec((fc_pad, o_pad), lambda k: (0, 0)),
                      pl.BlockSpec((1, o_pad), lambda k: (0, 0))],
            out_specs=pl.BlockSpec((b_pad, o_pad), lambda k: (0, 0)),
            scratch_shapes=[pltpu.VMEM((b_pad, h_pad), jnp.float32)],
        ),
        compiler_params=pltpu.CompilerParams(
            dimension_semantics=("arbitrary",)),
        cost_estimate=pl.CostEstimate(
            flops=2 * b_pad * n_pad * h_pad
                  + 2 * b_pad * h_pad * fc_pad
                  + 2 * b_pad * fc_pad * o_pad,
            transcendentals=0,
            bytes_accessed=2 * (b_pad * n_pad + n_pad * h_pad
                                + h_pad * fc_pad + fc_pad * o_pad)
                           + 4 * b_pad * o_pad),
    )(p, h, wf1, bf1, wf2, bf2)


# ------------------------------ full forward ----------------------------------

def gcn_baseline_forward(a_p, x, params, p_p, *, num_graphs, force_tiled=False):
    """GCN_baseline forward.

    a_p : (n_pad, n_pad) bf16 padded normalized adjacency (built padded).
    x   : (num_nodes, F) f32 node features (F left unpadded).
    p_p : (b_pad, n_pad) bf16 padded pooling matrix.
    """
    (w1, b1, w2, b2, wf1, bf1, wf2, bf2) = params
    n_pad = a_p.shape[0]
    b_pad = p_p.shape[0]
    f = x.shape[1]
    hidden = w1.shape[1]
    fc = wf1.shape[1]
    out_dim = wf2.shape[1]

    h_pad = _round_up(hidden, LANE)
    fc_pad = _round_up(fc, LANE)
    o_pad = _round_up(out_dim, LANE)

    def pad2(arr, rows, cols, dtype):
        out = jnp.zeros((rows, cols), dtype)
        return out.at[:arr.shape[0], :arr.shape[1]].set(arr.astype(dtype))

    x_p = pad2(x, n_pad, f, jnp.bfloat16)          # feature dim NOT padded
    w1_p = pad2(w1, f, h_pad, jnp.bfloat16)
    b1_p = pad2(b1, 1, h_pad, jnp.float32)
    w2_p = pad2(w2, h_pad, h_pad, jnp.bfloat16)
    b2_p = pad2(b2, 1, h_pad, jnp.float32)
    wf1_p = pad2(wf1, h_pad, fc_pad, jnp.bfloat16)
    bf1_p = pad2(bf1, 1, fc_pad, jnp.float32)
    wf2_p = pad2(wf2, fc_pad, o_pad, jnp.bfloat16)
    bf2_p = pad2(bf2, 1, o_pad, jnp.float32)

    fused_bytes = _fused_vmem_bytes(n_pad, f, h_pad, fc_pad, o_pad, b_pad)
    use_fused = (not force_tiled) and (fused_bytes <= FUSED_VMEM_BUDGET)

    if use_fused:
        # Single launch; A_hat resident in VMEM, read from HBM exactly once.
        out_p = pl.pallas_call(
            fused_forward_kernel,
            out_shape=jax.ShapeDtypeStruct((b_pad, o_pad), jnp.float32),
            compiler_params=pltpu.CompilerParams(
                vmem_limit_bytes=56 * 1024 * 1024),
            cost_estimate=pl.CostEstimate(
                flops=4 * n_pad * n_pad * h_pad
                      + 2 * n_pad * h_pad * (f + h_pad)
                      + 2 * b_pad * (n_pad * h_pad + h_pad * fc_pad
                                     + fc_pad * o_pad),
                transcendentals=0,
                bytes_accessed=2 * n_pad * n_pad + 2 * n_pad * f
                               + 2 * b_pad * n_pad + 4 * b_pad * o_pad),
        )(a_p, x_p, w1_p, b1_p, w2_p, b2_p, p_p, wf1_p, bf1_p, wf2_p, bf2_p)
    else:
        # Large-N fallback: tiled, transform fused into each layer's K-loop.
        tile = _tile_for_pad(n_pad)
        h1 = _gcn_layer(a_p, x_p, w1_p, b1_p, tile)
        h2 = _gcn_layer(a_p, h1, w2_p, b2_p, tile)
        if (b_pad * n_pad + n_pad * h_pad) * 2 <= (8 << 20):
            tile_pool = n_pad                       # single grid step
        else:
            tile_pool = tile
        out_p = _pool_fc(p_p, h2, wf1_p, bf1_p, wf2_p, bf2_p, tile_pool)

    return out_p[:num_graphs, :out_dim]


# ---------------------------- graph preprocessing ------------------------------

def build_normalized_adjacency(edge_index, num_nodes, n_pad):
    """PyG GCNConv normalization, built directly at padded size, cast once.

    D^-1/2 (A + I) D^-1/2 with self-loops on real nodes only.
    """
    src, dst = edge_index
    a = jnp.zeros((n_pad, n_pad), jnp.float32)
    a = a.at[dst, src].add(1.0)            # messages flow src -> dst
    a = jnp.minimum(a, 1.0)                # coalesce duplicate directed edges
    idx = jnp.arange(num_nodes)
    a = a.at[idx, idx].add(1.0)            # self-loops
    deg = a.sum(axis=1)
    dinv = jnp.where(deg > 0, 1.0 / jnp.sqrt(deg), 0.0)
    return (dinv[:, None] * a * dinv[None, :]).astype(jnp.bfloat16)


def build_pool_matrix(batch, num_graphs, b_pad, n_pad):
    """P[b, n] = 1 if node n belongs to graph b (global_add_pool as matmul)."""
    num_nodes = batch.shape[0]
    onehot = (batch[None, :] == jnp.arange(num_graphs)[:, None]
              ).astype(jnp.bfloat16)
    p = jnp.zeros((b_pad, n_pad), jnp.bfloat16)
    return p.at[:num_graphs, :num_nodes].set(onehot)


def init_params(key, node_features, hidden_dim, output_dim):
    ks = jax.random.split(key, 8)

    def glorot(k, shape):
        fan_in, fan_out = shape
        lim = jnp.sqrt(6.0 / (fan_in + fan_out))
        return jax.random.uniform(k, shape, jnp.float32, -lim, lim)

    w1 = glorot(ks[0], (node_features, hidden_dim))
    b1 = jnp.zeros((1, hidden_dim), jnp.float32)
    w2 = glorot(ks[1], (hidden_dim, hidden_dim))
    b2 = jnp.zeros((1, hidden_dim), jnp.float32)
    wf1 = glorot(ks[2], (hidden_dim, hidden_dim * 2))
    bf1 = 0.01 * jax.random.normal(ks[3], (1, hidden_dim * 2), jnp.float32)
    wf2 = glorot(ks[4], (hidden_dim * 2, output_dim))
    bf2 = 0.01 * jax.random.normal(ks[5], (1, output_dim), jnp.float32)
    return (w1, b1, w2, b2, wf1, bf1, wf2, bf2)


def reference_forward(a_hat, x, params, pool_mat):
    (w1, b1, w2, b2, wf1, bf1, wf2, bf2) = params
    h = jnp.maximum(a_hat @ (x @ w1) + b1, 0.0)
    h = jnp.maximum(a_hat @ (h @ w2) + b2, 0.0)
    g = pool_mat @ h
    z = jnp.maximum(g @ wf1 + bf1, 0.0)
    return z @ wf2 + bf2


if __name__ == "__main__":
    node_features, hidden_dim, output_dim = 8, 32, 4
    num_graphs, nodes_per_graph = 16, 32
    num_nodes = num_graphs * nodes_per_graph          # 512

    tile = _pick_tile(num_nodes)                      # 256 -> 2 row blocks
    n_pad = _round_up(num_nodes, tile)                # 512
    b_pad = _round_up(num_graphs, SUBLANE)            # 16

    key = jax.random.PRNGKey(0)
    k_x, k_p = jax.random.split(key)
    x = jax.random.normal(k_x, (num_nodes, node_features), jnp.float32)

    # Deterministic undirected ring within each graph component.
    src, dst = [], []
    for g in range(num_graphs):
        base = g * nodes_per_graph
        for i in range(nodes_per_graph):
            a, b = base + i, base + (i + 1) % nodes_per_graph
            src += [a, b]
            dst += [b, a]
    edge_index = jnp.array([src, dst], jnp.int32)
    batch = jnp.repeat(jnp.arange(num_graphs, dtype=jnp.int32), nodes_per_graph)

    a_p = build_normalized_adjacency(edge_index, num_nodes, n_pad)
    p_p = build_pool_matrix(batch, num_graphs, b_pad, n_pad)
    params = init_params(k_p, node_features, hidden_dim, output_dim)

    fwd = jax.jit(gcn_baseline_forward,
                  static_argnames=("num_graphs", "force_tiled"))

    # Fused single-launch path (A_hat resident in VMEM).
    out_fused = jax.block_until_ready(
        fwd(a_p, x, params, p_p, num_graphs=num_graphs, force_tiled=False))
    # Tiled fallback path (transform fused into each layer's K-loop).
    out_tiled = jax.block_until_ready(
        fwd(a_p, x, params, p_p, num_graphs=num_graphs, force_tiled=True))

    a_ref = a_p[:num_nodes, :num_nodes].astype(jnp.float32)
    pool_ref = p_p[:num_graphs, :num_nodes].astype(jnp.float32)
    ref = reference_forward(a_ref, x, params, pool_ref)

    for out in (out_fused, out_tiled):
        assert out.shape == (num_graphs, output_dim)
        assert bool(jnp.all(jnp.isfinite(out)))
        rel_err = float(jnp.max(jnp.abs(out - ref)) /
                        (jnp.max(jnp.abs(ref)) + 1e-6))
        assert rel_err < 5e-2, f"kernel deviates from f32 reference: {rel_err}"

    print("KERNEL_OK")
</pallas_src>

<mosaic_0001>
module attributes {stable_mosaic.version = 11 : i64} {
  func.func @fused_forward_kernel(%arg0: memref<512x512xbf16, #tpu.memory_space<vmem>>, %arg1: memref<512x8xbf16, #tpu.memory_space<vmem>>, %arg2: memref<8x128xbf16, #tpu.memory_space<vmem>>, %arg3: memref<1x128xf32, #tpu.memory_space<vmem>>, %arg4: memref<128x128xbf16, #tpu.memory_space<vmem>>, %arg5: memref<1x128xf32, #tpu.memory_space<vmem>>, %arg6: memref<16x512xbf16, #tpu.memory_space<vmem>>, %arg7: memref<128x128xbf16, #tpu.memory_space<vmem>>, %arg8: memref<1x128xf32, #tpu.memory_space<vmem>>, %arg9: memref<128x128xbf16, #tpu.memory_space<vmem>>, %arg10: memref<1x128xf32, #tpu.memory_space<vmem>>, %arg11: memref<16x128xf32, #tpu.memory_space<vmem>>) attributes {dimension_semantics = [], scalar_prefetch = 0 : i64, scratch_operands = 0 : i64, tpu.core_type = #tpu.core_type<tc>} {
    %c0 = arith.constant 0 : index
    %c0_0 = arith.constant 0 : index
    %0 = vector.load %arg0[%c0, %c0_0] : memref<512x512xbf16, #tpu.memory_space<vmem>>, vector<512x512xbf16>
    %c0_1 = arith.constant 0 : index
    %c0_2 = arith.constant 0 : index
    %1 = vector.load %arg1[%c0_1, %c0_2] : memref<512x8xbf16, #tpu.memory_space<vmem>>, vector<512x8xbf16>
    %c0_3 = arith.constant 0 : index
    %c0_4 = arith.constant 0 : index
    %2 = vector.load %arg2[%c0_3, %c0_4] : memref<8x128xbf16, #tpu.memory_space<vmem>>, vector<8x128xbf16>
    %cst = arith.constant dense<0.000000e+00> : vector<512x128xf32>
    %3 = tpu.matmul %1, %2, %cst {dimension_numbers = #tpu.dot_dimension_numbers<[1], [0], [0], [1], [0, 0, 1, 1], [], []>} : vector<512x8xbf16>, vector<8x128xbf16>, vector<512x128xf32> -> vector<512x128xf32>
    %4 = arith.truncf %3 : vector<512x128xf32> to vector<512x128xbf16>
    %cst_5 = arith.constant dense<0.000000e+00> : vector<512x128xf32>
    %5 = tpu.matmul %0, %4, %cst_5 {dimension_numbers = #tpu.dot_dimension_numbers<[1], [0], [0], [1], [0, 0, 1, 1], [], []>} : vector<512x512xbf16>, vector<512x128xbf16>, vector<512x128xf32> -> vector<512x128xf32>
    %c0_6 = arith.constant 0 : index
    %c0_7 = arith.constant 0 : index
    %6 = vector.load %arg3[%c0_6, %c0_7] : memref<1x128xf32, #tpu.memory_space<vmem>>, vector<1x128xf32>
    %7 = vector.broadcast %6 : vector<1x128xf32> to vector<512x128xf32>
    %8 = arith.addf %5, %7 : vector<512x128xf32>
    %cst_8 = arith.constant 0.000000e+00 : f32
    %9 = vector.broadcast %cst_8 : f32 to vector<512x128xf32>
    %10 = arith.maximumf %8, %9 : vector<512x128xf32>
    %11 = arith.truncf %10 : vector<512x128xf32> to vector<512x128xbf16>
    %c0_9 = arith.constant 0 : index
    %c0_10 = arith.constant 0 : index
    %12 = vector.load %arg4[%c0_9, %c0_10] : memref<128x128xbf16, #tpu.memory_space<vmem>>, vector<128x128xbf16>
    %cst_11 = arith.constant dense<0.000000e+00> : vector<512x128xf32>
    %13 = tpu.matmul %11, %12, %cst_11 {dimension_numbers = #tpu.dot_dimension_numbers<[1], [0], [0], [1], [0, 0, 1, 1], [], []>} : vector<512x128xbf16>, vector<128x128xbf16>, vector<512x128xf32> -> vector<512x128xf32>
    %14 = arith.truncf %13 : vector<512x128xf32> to vector<512x128xbf16>
    %cst_12 = arith.constant dense<0.000000e+00> : vector<512x128xf32>
    %15 = tpu.matmul %0, %14, %cst_12 {dimension_numbers = #tpu.dot_dimension_numbers<[1], [0], [0], [1], [0, 0, 1, 1], [], []>} : vector<512x512xbf16>, vector<512x128xbf16>, vector<512x128xf32> -> vector<512x128xf32>
    %c0_13 = arith.constant 0 : index
    %c0_14 = arith.constant 0 : index
    %16 = vector.load %arg5[%c0_13, %c0_14] : memref<1x128xf32, #tpu.memory_space<vmem>>, vector<1x128xf32>
    %17 = vector.broadcast %16 : vector<1x128xf32> to vector<512x128xf32>
    %18 = arith.addf %15, %17 : vector<512x128xf32>
    %cst_15 = arith.constant 0.000000e+00 : f32
    %19 = vector.broadcast %cst_15 : f32 to vector<512x128xf32>
    %20 = arith.maximumf %18, %19 : vector<512x128xf32>
    %c0_16 = arith.constant 0 : index
    %c0_17 = arith.constant 0 : index
    %21 = vector.load %arg6[%c0_16, %c0_17] : memref<16x512xbf16, #tpu.memory_space<vmem>>, vector<16x512xbf16>
    %22 = arith.truncf %20 : vector<512x128xf32> to vector<512x128xbf16>
    %cst_18 = arith.constant dense<0.000000e+00> : vector<16x128xf32>
    %23 = tpu.matmul %21, %22, %cst_18 {dimension_numbers = #tpu.dot_dimension_numbers<[1], [0], [0], [1], [0, 0, 1, 1], [], []>} : vector<16x512xbf16>, vector<512x128xbf16>, vector<16x128xf32> -> vector<16x128xf32>
    %24 = arith.truncf %23 : vector<16x128xf32> to vector<16x128xbf16>
    %c0_19 = arith.constant 0 : index
    %c0_20 = arith.constant 0 : index
    %25 = vector.load %arg7[%c0_19, %c0_20] : memref<128x128xbf16, #tpu.memory_space<vmem>>, vector<128x128xbf16>
    %cst_21 = arith.constant dense<0.000000e+00> : vector<16x128xf32>
    %26 = tpu.matmul %24, %25, %cst_21 {dimension_numbers = #tpu.dot_dimension_numbers<[1], [0], [0], [1], [0, 0, 1, 1], [], []>} : vector<16x128xbf16>, vector<128x128xbf16>, vector<16x128xf32> -> vector<16x128xf32>
    %c0_22 = arith.constant 0 : index
    %c0_23 = arith.constant 0 : index
    %27 = vector.load %arg8[%c0_22, %c0_23] : memref<1x128xf32, #tpu.memory_space<vmem>>, vector<1x128xf32>
    %28 = vector.broadcast %27 : vector<1x128xf32> to vector<16x128xf32>
    %29 = arith.addf %26, %28 : vector<16x128xf32>
    %cst_24 = arith.constant 0.000000e+00 : f32
    %30 = vector.broadcast %cst_24 : f32 to vector<16x128xf32>
    %31 = arith.maximumf %29, %30 : vector<16x128xf32>
    %32 = arith.truncf %31 : vector<16x128xf32> to vector<16x128xbf16>
    %c0_25 = arith.constant 0 : index
    %c0_26 = arith.constant 0 : index
    %33 = vector.load %arg9[%c0_25, %c0_26] : memref<128x128xbf16, #tpu.memory_space<vmem>>, vector<128x128xbf16>
    %cst_27 = arith.constant dense<0.000000e+00> : vector<16x128xf32>
    %34 = tpu.matmul %32, %33, %cst_27 {dimension_numbers = #tpu.dot_dimension_numbers<[1], [0], [0], [1], [0, 0, 1, 1], [], []>} : vector<16x128xbf16>, vector<128x128xbf16>, vector<16x128xf32> -> vector<16x128xf32>
    %c0_28 = arith.constant 0 : index
    %c0_29 = arith.constant 0 : index
    %35 = vector.load %arg10[%c0_28, %c0_29] : memref<1x128xf32, #tpu.memory_space<vmem>>, vector<1x128xf32>
    %36 = vector.broadcast %35 : vector<1x128xf32> to vector<16x128xf32>
    %37 = arith.addf %34, %36 : vector<16x128xf32>
    %c0_30 = arith.constant 0 : index
    %c0_31 = arith.constant 0 : index
    %38 = vector.load %arg11[%c0_30, %c0_31] : memref<16x128xf32, #tpu.memory_space<vmem>>, vector<16x128xf32>
    tpu.vector_store %arg11[%c0_30, %c0_31], %37 {strides = array<i32>} : memref<16x128xf32, #tpu.memory_space<vmem>>, vector<16x128xf32>,
    return
  }
}

</mosaic_0001>

<bundles_post_ra>
// kernel: gcn_baseline_forward.1
= control target key start
LH: loop header
LB: loop body
LE: loop exit
PB: predicated region body
PF: predicated region fallthrough
CT: control target
= control target key end

     0   :  { %16 = vsyncpa [#allocation3], 0  ;;  %s4901_s17 = smov [#allocation2]   ;;  %s5489_s0 = inlined_call_operand.hbm [shape: bf16[512,512], index: 0, kind: input, shape index: {}]   ;;  %s5490_s1 = inlined_call_operand.vmem [shape: bf16[512,8], index: 1, kind: input, shape index: {}]   ;;  %s5491_s2 = inlined_call_operand.vmem [shape: bf16[8,128], index: 2, kind: input, shape index: {}]   ;;  %s5492_s3 = inlined_call_operand.vmem [shape: f32[1,128], index: 3, kind: input, shape index: {}]   ;;  %s5493_s4 = inlined_call_operand.vmem [shape: bf16[128,128], index: 4, kind: input, shape index: {}]   ;;  %s5494_s5 = inlined_call_operand.vmem [shape: f32[1,128], index: 5, kind: input, shape index: {}]   ;;  %s5495_s6 = inlined_call_operand.vmem [shape: bf16[16,512], index: 6, kind: input, shape index: {}]   ;;  %s5496_s7 = inlined_call_operand.vmem [shape: bf16[128,128], index: 7, kind: input, shape index: {}]   ;;  %s5497_s8 = inlined_call_operand.vmem [shape: f32[1,128], index: 8, kind: input, shape index: {}]   ;;  %s5498_s9 = inlined_call_operand.vmem [shape: bf16[128,128], index: 9, kind: input, shape index: {}]   ;;  %s5499_s10 = inlined_call_operand.vmem [shape: f32[1,128], index: 10, kind: input, shape index: {}]   ;;  %s5500_s11 = inlined_call_operand.vmem [shape: f32[16,128], index: 11, kind: output, shape index: {}]  }
   0x1   :  { %s22_s18 = sshll.u32 %s4901_s17, 4  ;;  %s4877_s21 = scalar_lea.hbm %s5489_s0, 16384  ;;  %s23_s18 = int_to_ptr.vmem [resolvable:$true] %s22_s18 }
   0x2   :  { %p4878_p0 = scmp.ne.s32.totalorder %s5489_s0, %s4877_s21  ;;  %p4881_p1 = scmp.lt.u32.totalorder %s4877_s21, %s5489_s0 }
   0x4   :  { %p4883_p2 = pnand %p4881_p1, %p4878_p0 }
   0x6   :  { %4886 = shalt.err (!%p4883_p2)
}
   0x7   :  { %s4887_s26 = scalar_lea.vmem %s23_s18, 16384  ;;  %p4892_p4 = scmp.lt.s32.totalorder %s23_s18, %s23_s18 }
   0x8   :  { %p4888_p3 = scmp.ne.s32.totalorder %s23_s18, %s4887_s26  ;;  %p4893_p5 = scmp.lt.s32.totalorder %s4887_s26, %s4887_s26 }
   0xa   :  { %p4894_p6 = por %p4893_p5, %p4892_p4 }
   0xc   :  { %p4895_p7 = pnand %p4894_p6, %p4888_p3 }
   0xe   :  { %4898 = shalt.err (!%p4895_p7)
}
   0xf   :  { %s4902_s27 = smov 256   ;;  %s4903_s28 = smov 16  }
  0x10   :  { %28 = dma.hbm_to_vmem [thread:$0]  %s5489_s0, 16384, %s23_s18, [#allocation3], %s4902_s27, %s4902_s27, %s4903_s28  }
  0x11   :  { %4899 = dma.done.wait [#allocation3], 16384  }
  0x12   :  { %4900 = vsyncadd [#allocation3], 4294950912  ;;  %vm503_vm0 = vcmask 1043456   ;;  %vm406_vm1 = vcmask 64512   ;;  %v245_v0 = vld [vmem:[%s5491_s2] sm:$0xf] }
  0x13   :  { %4487 = vmatprep.subr.msk.bf16.mxu0 %vm503_vm0, %v245_v0  ;;  %v505_v1 = vsel %vm503_vm0, %v245_v0, 0  ;;  %v4495_v2 = vld [vmem:[%s5490_s1] sm:$0xff]   ;;  %4488 = vmatprep.subr.msk.bf16.mxu1 %vm503_vm0, %v245_v0  ;;  %v4496_v3 = vld [vmem:[%s5490_s1 + $0x8] sm:$0xff]   ;;  %v4497_v4 = vld [vmem:[%s5490_s1 + $0x10] sm:$0xff]   ;;  %v4904_v22 = vmov 0   ;;  %vm4906_vm2 = vmmov 0  }
  0x14   :  { %3916 = vmatpush3.bf16.msra.mxu0 %v505_v1  ;;  %4102 = vmatpush3.bf16.msra.mxu1 %v505_v1  ;;  %v4498_v5 = vld [vmem:[%s5490_s1 + $0x18] sm:$0xff]   ;;  %v4499_v6 = vld [vmem:[%s5490_s1 + $0x20] sm:$0xff]   ;;  %v4500_v7 = vld [vmem:[%s5490_s1 + $0x28] sm:$0xff]  }
  0x15   :  { %3917 = vmatprep.mubr.msk.bf16.mxu0 %vm406_vm1, %v4495_v2  ;;  %v4509_v8 = vld [vmem:[%s5490_s1 + $0x70] sm:$0xff]   ;;  %v4510_v9 = vld [vmem:[%s5490_s1 + $0x78] sm:$0xff]   ;;  %v4511_v10 = vld [vmem:[%s5490_s1 + $0x80] sm:$0xff]   ;;  %1475 = vmatprep.subr.bf16.mxu1 %v4904_v22 }
  0x16   :  { %3945 = vmatprep.mubr.msk.bf16.mxu1 %vm406_vm1, %v4509_v8  ;;  %v4501_v11 = vld [vmem:[%s5490_s1 + $0x30] sm:$0xff]   ;;  %v4512_v12 = vld [vmem:[%s5490_s1 + $0x88] sm:$0xff]   ;;  %v4502_v14 = vld [vmem:[%s5490_s1 + $0x38] sm:$0xff]  }
  0x17   :  { %3918 = vmatmul.mubr.msk.bf16.vlgmr.msra.gmra.mrb[0].mxu0 %vm406_vm1, %v4496_v3  ;;  %3946 = vmatmul.mubr.msk.bf16.vlgmr.msra.gmra.mrb[0].mxu1 %vm406_vm1, %v4510_v9  ;;  %v4513_v13 = vld [vmem:[%s5490_s1 + $0x90] sm:$0xff]   ;;  %v4503_v15 = vld [vmem:[%s5490_s1 + $0x40] sm:$0xff]   ;;  %v4514_v16 = vld [vmem:[%s5490_s1 + $0x98] sm:$0xff]  }
  0x18   :  { %3921 = vmatprep.mubr.msk.bf16.mxu0 %vm406_vm1, %v4497_v4  ;;  %3949 = vmatprep.mubr.msk.bf16.mxu1 %vm406_vm1, %v4511_v10  ;;  %v4504_v17 = vld [vmem:[%s5490_s1 + $0x48] sm:$0xff]   ;;  %v4505_v18 = vld [vmem:[%s5490_s1 + $0x50] sm:$0xff]   ;;  %v4506_v19 = vld [vmem:[%s5490_s1 + $0x58] sm:$0xff]  }
  0x19   :  { %v4507_v20 = vld [vmem:[%s5490_s1 + $0x60] sm:$0xff]   ;;  %v4508_v21 = vld [vmem:[%s5490_s1 + $0x68] sm:$0xff]   ;;  %v4517_v25 = vld [vmem:[%s5490_s1 + $0xb0] sm:$0xff]  }
  0x1a   :  { %v4515_v23 = vld [vmem:[%s5490_s1 + $0xa0] sm:$0xff]   ;;  %v4516_v24 = vld [vmem:[%s5490_s1 + $0xa8] sm:$0xff]   ;;  %v4518_v26 = vld [vmem:[%s5490_s1 + $0xb8] sm:$0xff]  }
  0x1b   :  { %v4519_v27 = vld [vmem:[%s5490_s1 + $0xc0] sm:$0xff]   ;;  %v4520_v28 = vld [vmem:[%s5490_s1 + $0xc8] sm:$0xff]   ;;  %v4521_v29 = vld [vmem:[%s5490_s1 + $0xd0] sm:$0xff]  }
  0x1c   :  { %v4522_v30 = vld [vmem:[%s5490_s1 + $0xd8] sm:$0xff]   ;;  %v4523_v31 = vld [vmem:[%s5490_s1 + $0xe0] sm:$0xff]   ;;  %v4524_v32 = vld [vmem:[%s5490_s1 + $0xe8] sm:$0xff]  }
  0x1d   :  { %v4525_v33 = vld [vmem:[%s5490_s1 + $0xf0] sm:$0xff]   ;;  %v4526_v34 = vld [vmem:[%s5490_s1 + $0xf8] sm:$0xff]  }
  0x1e   :  { %v4529_v35 = vld [vmem:[#allocation2 + $0x4] ss:$16 sps:$4 sm:$0xff]  }
  0x1f   :  { %3922 = vmatmul.mubr.msk.bf16.gmra.mrb[4].mxu0 %vm406_vm1, %v4498_v5  ;;  %3950 = vmatmul.mubr.msk.bf16.gmra.mrb[4].mxu1 %vm406_vm1, %v4512_v12 }
  0x20   :  { %3925 = vmatprep.mubr.msk.bf16.mxu0 %vm406_vm1, %v4499_v6  ;;  %3953 = vmatprep.mubr.msk.bf16.mxu1 %vm406_vm1, %v4513_v13 }
  0x27   :  { %3926 = vmatmul.mubr.msk.bf16.gmra.mrb[8].mxu0 %vm406_vm1, %v4500_v7  ;;  %3954 = vmatmul.mubr.msk.bf16.gmra.mrb[8].mxu1 %vm406_vm1, %v4514_v16 }
  0x28   :  { %3929 = vmatprep.mubr.msk.bf16.mxu0 %vm406_vm1, %v4501_v11  ;;  %3957 = vmatprep.mubr.msk.bf16.mxu1 %vm406_vm1, %v4515_v23 }
  0x2f   :  { %3930 = vmatmul.mubr.msk.bf16.gmra.mrb[12].mxu0 %vm406_vm1, %v4502_v14  ;;  %3958 = vmatmul.mubr.msk.bf16.gmra.mrb[12].mxu1 %vm406_vm1, %v4516_v24 }
  0x30   :  { %3933 = vmatprep.mubr.msk.bf16.mxu0 %vm406_vm1, %v4503_v15  ;;  %3961 = vmatprep.mubr.msk.bf16.mxu1 %vm406_vm1, %v4517_v25 }
  0x37   :  { %3934 = vmatmul.mubr.msk.bf16.gmra.mrb[16].mxu0 %vm406_vm1, %v4504_v17  ;;  %3962 = vmatmul.mubr.msk.bf16.gmra.mrb[16].mxu1 %vm406_vm1, %v4518_v26 }
  0x38   :  { %3937 = vmatprep.mubr.msk.bf16.mxu0 %vm406_vm1, %v4505_v18  ;;  %3965 = vmatprep.mubr.msk.bf16.mxu1 %vm406_vm1, %v4519_v27 }
  0x3f   :  { %3938 = vmatmul.mubr.msk.bf16.gmra.mrb[20].mxu0 %vm406_vm1, %v4506_v19  ;;  %3966 = vmatmul.mubr.msk.bf16.gmra.mrb[20].mxu1 %vm406_vm1, %v4520_v28 }
  0x40   :  { %3941 = vmatprep.mubr.msk.bf16.mxu0 %vm406_vm1, %v4507_v20  ;;  %3969 = vmatprep.mubr.msk.bf16.mxu1 %vm406_vm1, %v4521_v29 }
  0x47   :  { %3942 = vmatmul.mubr.msk.bf16.gmra.mrb[24].mxu0 %vm406_vm1, %v4508_v21  ;;  %3970 = vmatmul.mubr.msk.bf16.gmra.mrb[24].mxu1 %vm406_vm1, %v4522_v30 }
  0x48   :  { %3973 = vmatprep.mubr.msk.bf16.mxu1 %vm406_vm1, %v4523_v31 }
  0x4f   :  { %3974 = vmatmul.mubr.msk.bf16.gmra.mrb[28].mxu1 %vm406_vm1, %v4524_v32 }
  0x50   :  { %3977 = vmatprep.mubr.msk.bf16.mxu1 %vm406_vm1, %v4525_v33  ;;  %v4527_v33 = vld [vmem:[#allocation2] ss:$16 sps:$4 sm:$0xff]  }
  0x57   :  { %3978 = vmatmul.mubr.msk.bf16.gmra.mrb[32].mxu1 %vm406_vm1, %v4526_v34  ;;  %v4530_v34 = vld [vmem:[#allocation2 + $0x24] ss:$16 sps:$4 sm:$0xff]  }
  0x58   :  { %1507 = vmatprep.mubr.bf16.mxu1 %v4529_v35  ;;  %v4532_v35 = vld [vmem:[#allocation2 + $0x20] ss:$16 sps:$4 sm:$0xff]  }
  0xea   :  { %v3919_v36 = vpop.f32.mrb[0].mxu0  ;;  %v5113_v48 = vpop.f32.mrb[0].mxu1 }
  0xeb   :  { %v541_v37 = vpop.f32.mrb[1].mxu0  ;;  %v5115_v49 = vpop.f32.mrb[1].mxu1 }
  0xec   :  { %v3920_v38 = vpop.f32.mrb[2].mxu0  ;;  %v5118_v50 = vpop.f32.mrb[2].mxu1 }
  0xed   :  { %v797_v39 = vpack.c.bf16 %v3920_v38, %v3919_v36  ;;  %v544_v40 = vpop.f32.mrb[3].mxu0  ;;  %v811_v52 = vpack.c.bf16 %v5118_v50, %v5113_v48  ;;  %v656_v53 = vpop.f32.mrb[3].mxu1  ;;  %v4533_v36 = vld [vmem:[#allocation2 + $0x44] ss:$16 sps:$4 sm:$0xff]  }
  0xee   :  { %v796_v41 = vpack.c.bf16 %v544_v40, %v541_v37  ;;  %v810_v55 = vpack.c.bf16 %v656_v53, %v5115_v49  ;;  %v4535_v37 = vld [vmem:[#allocation2 + $0x40] ss:$16 sps:$4 sm:$0xff]   ;;  %v4536_v38 = vld [vmem:[#allocation2 + $0x64] ss:$16 sps:$4 sm:$0xff]  }
  0xef   :  { %v4539_v40 = vld [vmem:[#allocation2 + $0x84] ss:$16 sps:$4 sm:$0xff]   ;;  %v4544_v49 = vld [vmem:[#allocation2 + $0xa0] ss:$16 sps:$4 sm:$0xff]  }
  0xf0   :  { %1476 = vmatpush1.bf16.msra.mxu1 %v796_v41 }
  0xf1   :  { %1477 = vmatprep.subr.bf16.mxu1 %v4904_v22 }
  0xf2   :  { %v3923_v42 = vpop.f32.mrb[4].mxu0  ;;  %v5124_v60 = vpop.f32.mrb[4].mxu1 }
  0xf3   :  { %v557_v43 = vpop.f32.mrb[5].mxu0  ;;  %v669_v61 = vpop.f32.mrb[5].mxu1 }
  0xf4   :  { %v3924_v44 = vpop.f32.mrb[6].mxu0  ;;  %1478 = vmatpush1.bf16.msra.mxu1 %v797_v39  ;;  %v3952_v4 = vpop.f32.mrb[6].mxu1  ;;  %v4538_v39 = vld [vmem:[#allocation2 + $0x60] ss:$16 sps:$4 sm:$0xff]  }
  0xf5   :  { %v799_v45 = vpack.c.bf16 %v3924_v44, %v3923_v42  ;;  %v560_v46 = vpop.f32.mrb[7].mxu0  ;;  %1479 = vmatprep.subr.bf16.mxu1 %v4904_v22  ;;  %v813_v5 = vpack.c.bf16 %v3952_v4, %v5124_v60  ;;  %v672_v6 = vpop.f32.mrb[7].mxu1  ;;  %v4541_v44 = vld [vmem:[#allocation2 + $0x80] ss:$16 sps:$4 sm:$0xff]  }
  0xf6   :  { %v798_v47 = vpack.c.bf16 %v560_v46, %v557_v43  ;;  %v812_v7 = vpack.c.bf16 %v672_v6, %v669_v61 }
  0xf8   :  { %1480 = vmatpush1.bf16.msra.mxu1 %v798_v47  ;;  %v4542_v47 = vld [vmem:[#allocation2 + $0xa4] ss:$16 sps:$4 sm:$0xff]  }
  0xf9   :  { %1481 = vmatprep.subr.bf16.mxu1 %v4904_v22 }
  0xfa   :  { %v3927_v51 = vpop.f32.mrb[8].mxu0  ;;  %v3955_v27 = vpop.f32.mrb[8].mxu1 }
  0xfb   :  { %v573_v54 = vpop.f32.mrb[9].mxu0  ;;  %v685_v28 = vpop.f32.mrb[9].mxu1 }
  0xfc   :  { %v3928_v56 = vpop.f32.mrb[10].mxu0  ;;  %1482 = vmatpush1.bf16.msra.mxu1 %v799_v45  ;;  %v3956_v29 = vpop.f32.mrb[10].mxu1 }
  0xfd   :  { %v801_v57 = vpack.c.bf16 %v3928_v56, %v3927_v51  ;;  %v576_v58 = vpop.f32.mrb[11].mxu0  ;;  %1483 = vmatprep.subr.bf16.mxu1 %v4904_v22  ;;  %v815_v30 = vpack.c.bf16 %v3956_v29, %v3955_v27  ;;  %v688_v31 = vpop.f32.mrb[11].mxu1  ;;  %v4545_v51 = vld [vmem:[#allocation2 + $0xc4] ss:$16 sps:$4 sm:$0xff]  }
  0xfe   :  { %v800_v59 = vpack.c.bf16 %v576_v58, %v573_v54  ;;  %v814_v32 = vpack.c.bf16 %v688_v31, %v685_v28  ;;  %v4560_v27 = vld [vmem:[#allocation2 + $0x164] ss:$16 sps:$4 sm:$0xff]   ;;  %v4562_v28 = vld [vmem:[#allocation2 + $0x160] ss:$16 sps:$4 sm:$0xff]  }
  0xff   :  { %v4563_v29 = vld [vmem:[#allocation2 + $0x184] ss:$16 sps:$4 sm:$0xff]  }
 0x100   :  { %1484 = vmatpush1.bf16.msra.mxu1 %v800_v59  ;;  %v4548_v59 = vld [vmem:[#allocation2 + $0xe4] ss:$16 sps:$4 sm:$0xff]  }
 0x101   :  { %1485 = vmatprep.subr.bf16.mxu1 %v4904_v22  ;;  %v4566_v31 = vld [vmem:[#allocation2 + $0x1a4] ss:$16 sps:$4 sm:$0xff]  }
 0x102   :  { %v3931_v62 = vpop.f32.mrb[12].mxu0  ;;  %v3959_v41 = vpop.f32.mrb[12].mxu1 }
 0x103   :  { %v589_v63 = vpop.f32.mrb[13].mxu0  ;;  %v701_v42 = vpop.f32.mrb[13].mxu1 }
 0x104   :  { %v3932_v0 = vpop.f32.mrb[14].mxu0  ;;  %1486 = vmatpush1.bf16.msra.mxu1 %v801_v57  ;;  %v3960_v43 = vpop.f32.mrb[14].mxu1  ;;  %v4547_v57 = vld [vmem:[#allocation2 + $0xc0] ss:$16 sps:$4 sm:$0xff]  }
 0x105   :  { %v803_v1 = vpack.c.bf16 %v3932_v0, %v3931_v62  ;;  %v592_v2 = vpop.f32.mrb[15].mxu0  ;;  %1487 = vmatprep.subr.bf16.mxu1 %v4904_v22  ;;  %v817_v45 = vpack.c.bf16 %v3960_v43, %v3959_v41  ;;  %v704_v46 = vpop.f32.mrb[15].mxu1  ;;  %v4581_v41 = vld [vmem:[#allocation2 + $0x244] ss:$16 sps:$4 sm:$0xff]  }
 0x106   :  { %v802_v3 = vpack.c.bf16 %v592_v2, %v589_v63  ;;  %v816_v48 = vpack.c.bf16 %v704_v46, %v701_v42  ;;  %v4583_v42 = vld [vmem:[#allocation2 + $0x240] ss:$16 sps:$4 sm:$0xff]   ;;  %v4584_v43 = vld [vmem:[#allocation2 + $0x264] ss:$16 sps:$4 sm:$0xff]  }
 0x107   :  { %v4589_v46 = vld [vmem:[#allocation2 + $0x280] ss:$16 sps:$4 sm:$0xff]  }
 0x108   :  { %1488 = vmatpush1.bf16.msra.mxu1 %v802_v3  ;;  %v4551_v3 = vld [vmem:[#allocation2 + $0x104] ss:$16 sps:$4 sm:$0xff]  }
 0x109   :  { %1489 = vmatprep.subr.bf16.mxu1 %v4904_v22 }
 0x10a   :  { %v3935_v8 = vpop.f32.mrb[16].mxu0  ;;  %v3963_v50 = vpop.f32.mrb[16].mxu1 }
 0x10b   :  { %v605_v9 = vpop.f32.mrb[17].mxu0 }
 0x10c   :  { %v3936_v10 = vpop.f32.mrb[18].mxu0  ;;  %1490 = vmatpush1.bf16.msra.mxu1 %v803_v1  ;;  %v4550_v1 = vld [vmem:[#allocation2 + $0xe0] ss:$16 sps:$4 sm:$0xff]  }
 0x10d   :  { %v805_v11 = vpack.c.bf16 %v3936_v10, %v3935_v8  ;;  %v608_v12 = vpop.f32.mrb[19].mxu0  ;;  %1491 = vmatprep.subr.bf16.mxu1 %v4904_v22 }
 0x10e   :  { %v804_v13 = vpack.c.bf16 %v608_v12, %v605_v9  ;;  %v4553_v9 = vld [vmem:[#allocation2 + $0x100] ss:$16 sps:$4 sm:$0xff]  }
 0x110   :  { %1492 = vmatpush1.bf16.msra.mxu1 %v804_v13 }
 0x111   :  { %1493 = vmatprep.subr.bf16.mxu1 %v4904_v22 }
 0x112   :  { %v3939_v14 = vpop.f32.mrb[20].mxu0 }
 0x113   :  { %v621_v15 = vpop.f32.mrb[21].mxu0 }
 0x114   :  { %v3940_v16 = vpop.f32.mrb[22].mxu0  ;;  %1494 = vmatpush1.bf16.msra.mxu1 %v805_v11  ;;  %v4554_v11 = vld [vmem:[#allocation2 + $0x124] ss:$16 sps:$4 sm:$0xff]  }
 0x115   :  { %v807_v17 = vpack.c.bf16 %v3940_v16, %v3939_v14  ;;  %v624_v18 = vpop.f32.mrb[23].mxu0  ;;  %1495 = vmatprep.subr.bf16.mxu1 %v4904_v22 }
 0x116   :  { %v806_v19 = vpack.c.bf16 %v624_v18, %v621_v15 }
 0x118   :  { %1496 = vmatpush1.bf16.msra.mxu1 %v806_v19  ;;  %v4557_v19 = vld [vmem:[#allocation2 + $0x144] ss:$16 sps:$4 sm:$0xff]  }
 0x119   :  { %1497 = vmatprep.subr.bf16.mxu1 %v4904_v22 }
 0x11a   :  { %v3943_v20 = vpop.f32.mrb[24].mxu0 }
 0x11b   :  { %v637_v21 = vpop.f32.mrb[25].mxu0 }
 0x11c   :  { %v3944_v23 = vpop.f32.mrb[26].mxu0  ;;  %1498 = vmatpush1.bf16.msra.mxu1 %v807_v17  ;;  %v4556_v17 = vld [vmem:[#allocation2 + $0x120] ss:$16 sps:$4 sm:$0xff]  }
 0x11d   :  { %v809_v24 = vpack.c.bf16 %v3944_v23, %v3943_v20  ;;  %v640_v25 = vpop.f32.mrb[27].mxu0  ;;  %1499 = vmatprep.subr.bf16.mxu1 %v4904_v22 }
 0x11e   :  { %v808_v26 = vpack.c.bf16 %v640_v25, %v637_v21 }
 0x120   :  { %1500 = vmatpush1.bf16.msra.mxu1 %v808_v26  ;;  %v4559_v26 = vld [vmem:[#allocation2 + $0x140] ss:$16 sps:$4 sm:$0xff]  }
 0x121   :  { %1501 = vmatprep.subr.bf16.mxu1 %v4904_v22 }
 0x124   :  { %1502 = vmatpush1.bf16.msra.mxu1 %v809_v24 }
 0x125   :  { %1503 = vmatprep.subr.bf16.mxu1 %v4904_v22 }
 0x128   :  { %1504 = vmatpush1.bf16.msra.mxu1 %v810_v55 }
 0x129   :  { %1505 = vmatprep.subr.bf16.mxu1 %v4904_v22 }
 0x12c   :  { %1506 = vmatpush1.bf16.msra.mxu1 %v811_v52  ;;  %v717_v52 = vpop.f32.mrb[17].mxu1 }
 0x12d   :  { %1764 = vmatprep.subr.bf16.mxu1 %v4904_v22  ;;  %v3964_v53 = vpop.f32.mrb[18].mxu1 }
 0x12e   :  { %v819_v54 = vpack.c.bf16 %v3964_v53, %v3963_v50  ;;  %v720_v55 = vpop.f32.mrb[19].mxu1  ;;  %v4595_v50 = vld [vmem:[#allocation2 + $0x2c0] ss:$16 sps:$4 sm:$0xff]   ;;  %v4599_v53 = vld [vmem:[#allocation2 + $0x304] ss:$16 sps:$4 sm:$0xff]  }
 0x12f   :  { %1508 = vmatmul.mubr.bf16.vlgmr.msra.gmra.mrb[36].mxu1 %v4527_v33  ;;  %v818_v56 = vpack.c.bf16 %v720_v55, %v717_v52  ;;  %v3967_v58 = vpop.f32.mrb[20].mxu1  ;;  %v4569_v33 = vld [vmem:[#allocation2 + $0x1c4] ss:$16 sps:$4 sm:$0xff]   ;;  %v4598_v52 = vld [vmem:[#allocation2 + $0x2e0] ss:$16 sps:$4 sm:$0xff]  }
 0x130   :  { %1515 = vmatprep.mubr.bf16.mxu1 %v4530_v34  ;;  %1765 = vmatpush1.bf16.msra.mxu1 %v812_v7  ;;  %v733_v60 = vpop.f32.mrb[21].mxu1  ;;  %v4571_v34 = vld [vmem:[#allocation2 + $0x1c0] ss:$16 sps:$4 sm:$0xff]   ;;  %v4602_v55 = vld [vmem:[#allocation2 + $0x324] ss:$16 sps:$4 sm:$0xff]  }
 0x131   :  { %1766 = vmatprep.subr.bf16.mxu1 %v4904_v22  ;;  %v3968_v61 = vpop.f32.mrb[22].mxu1 }
 0x132   :  { %v821_v62 = vpack.c.bf16 %v3968_v61, %v3967_v58  ;;  %v736_v63 = vpop.f32.mrb[23].mxu1  ;;  %v4607_v58 = vld [vmem:[#allocation2 + $0x340] ss:$16 sps:$4 sm:$0xff]   ;;  %v4611_v61 = vld [vmem:[#allocation2 + $0x384] ss:$16 sps:$4 sm:$0xff]  }
 0x133   :  { %v820_v0 = vpack.c.bf16 %v736_v63, %v733_v60  ;;  %v3971_v2 = vpop.f32.mrb[24].mxu1  ;;  %v4610_v60 = vld [vmem:[#allocation2 + $0x360] ss:$16 sps:$4 sm:$0xff]   ;;  %v4614_v63 = vld [vmem:[#allocation2 + $0x3a4] ss:$16 sps:$4 sm:$0xff]  }
 0x134   :  { %1767 = vmatpush1.bf16.msra.mxu1 %v813_v5  ;;  %v749_v4 = vpop.f32.mrb[25].mxu1 }
 0x135   :  { %1768 = vmatprep.subr.bf16.mxu1 %v4904_v22  ;;  %v3972_v5 = vpop.f32.mrb[26].mxu1 }
 0x136   :  { %v823_v6 = vpack.c.bf16 %v3972_v5, %v3971_v2  ;;  %v752_v7 = vpop.f32.mrb[27].mxu1  ;;  %v4619_v2 = vld [vmem:[#allocation2 + $0x3c0] ss:$16 sps:$4 sm:$0xff]   ;;  %v4625_v5 = vld [vmem:[#allocation2 + $0xc] ss:$16 sps:$4 sm:$0xff]  }
 0x137   :  { %1516 = vmatmul.mubr.bf16.gmra.mrb[40].mxu1 %v4532_v35  ;;  %v822_v8 = vpack.c.bf16 %v752_v7, %v749_v4  ;;  %v3975_v10 = vpop.f32.mrb[28].mxu1  ;;  %v4572_v35 = vld [vmem:[#allocation2 + $0x1e4] ss:$16 sps:$4 sm:$0xff]   ;;  %v4622_v4 = vld [vmem:[#allocation2 + $0x3e0] ss:$16 sps:$4 sm:$0xff]  }
 0x138   :  { %1523 = vmatprep.mubr.bf16.mxu1 %v4533_v36  ;;  %1769 = vmatpush1.bf16.msra.mxu1 %v814_v32  ;;  %v765_v12 = vpop.f32.mrb[29].mxu1  ;;  %v4568_v32 = vld [vmem:[#allocation2 + $0x1a0] ss:$16 sps:$4 sm:$0xff]   ;;  %v4626_v7 = vld [vmem:[#allocation2 + $0x2c] ss:$16 sps:$4 sm:$0xff]  }
 0x139   :  { %1770 = vmatprep.subr.bf16.mxu1 %v4904_v22  ;;  %v3976_v13 = vpop.f32.mrb[30].mxu1  ;;  %v4574_v36 = vld [vmem:[#allocation2 + $0x1e0] ss:$16 sps:$4 sm:$0xff]  }
 0x13a   :  { %v825_v14 = vpack.c.bf16 %v3976_v13, %v3975_v10  ;;  %v768_v15 = vpop.f32.mrb[31].mxu1  ;;  %v4631_v10 = vld [vmem:[#allocation2 + $0x48] ss:$16 sps:$4 sm:$0xff]   ;;  %v4635_v13 = vld [vmem:[#allocation2 + $0x8c] ss:$16 sps:$4 sm:$0xff]  }
 0x13b   :  { %v824_v16 = vpack.c.bf16 %v768_v15, %v765_v12  ;;  %v3979_v18 = vpop.f32.mrb[32].mxu1  ;;  %v4634_v12 = vld [vmem:[#allocation2 + $0x68] ss:$16 sps:$4 sm:$0xff]   ;;  %v4638_v15 = vld [vmem:[#allocation2 + $0xac] ss:$16 sps:$4 sm:$0xff]  }
 0x13c   :  { %1771 = vmatpush1.bf16.msra.mxu1 %v815_v30  ;;  %v781_v20 = vpop.f32.mrb[33].mxu1  ;;  %v4565_v30 = vld [vmem:[#allocation2 + $0x180] ss:$16 sps:$4 sm:$0xff]  }
 0x13d   :  { %1772 = vmatprep.subr.bf16.mxu1 %v4904_v22  ;;  %v3980_v21 = vpop.f32.mrb[34].mxu1 }
 0x13e   :  { %v827_v23 = vpack.c.bf16 %v3980_v21, %v3979_v18  ;;  %v784_v24 = vpop.f32.mrb[35].mxu1  ;;  %v4643_v18 = vld [vmem:[#allocation2 + $0xc8] ss:$16 sps:$4 sm:$0xff]   ;;  %v4647_v21 = vld [vmem:[#allocation2 + $0x10c] ss:$16 sps:$4 sm:$0xff]  }
 0x13f   :  { %1524 = vmatmul.mubr.bf16.gmra.mrb[44].mxu1 %v4535_v37  ;;  %v826_v25 = vpack.c.bf16 %v784_v24, %v781_v20  ;;  %v4575_v37 = vld [vmem:[#allocation2 + $0x204] ss:$16 sps:$4 sm:$0xff]   ;;  %v4646_v20 = vld [vmem:[#allocation2 + $0xe8] ss:$16 sps:$4 sm:$0xff]   ;;  %v4650_v24 = vld [vmem:[#allocation2 + $0x12c] ss:$16 sps:$4 sm:$0xff]  }
 0x140   :  { %1531 = vmatprep.mubr.bf16.mxu1 %v4536_v38  ;;  %1773 = vmatpush1.bf16.msra.mxu1 %v816_v48  ;;  %v4577_v38 = vld [vmem:[#allocation2 + $0x200] ss:$16 sps:$4 sm:$0xff]  }
 0x141   :  { %1774 = vmatprep.subr.bf16.mxu1 %v4904_v22  ;;  %v4592_v48 = vld [vmem:[#allocation2 + $0x2a0] ss:$16 sps:$4 sm:$0xff]  }
 0x144   :  { %1775 = vmatpush1.bf16.msra.mxu1 %v817_v45  ;;  %v4587_v45 = vld [vmem:[#allocation2 + $0x284] ss:$16 sps:$4 sm:$0xff]  }
 0x145   :  { %1776 = vmatprep.subr.bf16.mxu1 %v4904_v22 }
 0x147   :  { %1532 = vmatmul.mubr.bf16.gmra.mrb[48].mxu1 %v4538_v39  ;;  %v4578_v39 = vld [vmem:[#allocation2 + $0x224] ss:$16 sps:$4 sm:$0xff]  }
 0x148   :  { %1539 = vmatprep.mubr.bf16.mxu1 %v4539_v40  ;;  %1777 = vmatpush1.bf16.msra.mxu1 %v818_v56  ;;  %v4580_v40 = vld [vmem:[#allocation2 + $0x220] ss:$16 sps:$4 sm:$0xff]  }
 0x149   :  { %1778 = vmatprep.subr.bf16.mxu1 %v4904_v22  ;;  %v4604_v56 = vld [vmem:[#allocation2 + $0x320] ss:$16 sps:$4 sm:$0xff]  }
 0x14c   :  { %1779 = vmatpush1.bf16.msra.mxu1 %v819_v54  ;;  %v4601_v54 = vld [vmem:[#allocation2 + $0x300] ss:$16 sps:$4 sm:$0xff]  }
 0x14d   :  { %1780 = vmatprep.subr.bf16.mxu1 %v4904_v22 }
 0x14f   :  { %1540 = vmatmul.mubr.bf16.gmra.mrb[52].mxu1 %v4541_v44  ;;  %v4586_v44 = vld [vmem:[#allocation2 + $0x260] ss:$16 sps:$4 sm:$0xff]  }
 0x150   :  { %1547 = vmatprep.mubr.bf16.mxu1 %v4542_v47  ;;  %1781 = vmatpush1.bf16.msra.mxu1 %v820_v0  ;;  %v4590_v47 = vld [vmem:[#allocation2 + $0x2a4] ss:$16 sps:$4 sm:$0xff]   ;;  %v4616_v0 = vld [vmem:[#allocation2 + $0x3a0] ss:$16 sps:$4 sm:$0xff]  }
 0x151   :  { %1782 = vmatprep.subr.bf16.mxu1 %v4904_v22 }
 0x154   :  { %1783 = vmatpush1.bf16.msra.mxu1 %v821_v62  ;;  %v4613_v62 = vld [vmem:[#allocation2 + $0x380] ss:$16 sps:$4 sm:$0xff]  }
 0x155   :  { %1784 = vmatprep.subr.bf16.mxu1 %v4904_v22 }
 0x157   :  { %1548 = vmatmul.mubr.bf16.gmra.mrb[56].mxu1 %v4544_v49  ;;  %v4593_v49 = vld [vmem:[#allocation2 + $0x2c4] ss:$16 sps:$4 sm:$0xff]  }
 0x158   :  { %1555 = vmatprep.mubr.bf16.mxu1 %v4545_v51  ;;  %1785 = vmatpush1.bf16.msra.mxu1 %v822_v8  ;;  %v4596_v51 = vld [vmem:[#allocation2 + $0x2e4] ss:$16 sps:$4 sm:$0xff]   ;;  %v4628_v8 = vld [vmem:[#allocation2 + $0x28] ss:$16 sps:$4 sm:$0xff]  }
 0x159   :  { %1786 = vmatprep.subr.bf16.mxu1 %v4904_v22 }
 0x15c   :  { %1787 = vmatpush1.bf16.msra.mxu1 %v823_v6  ;;  %v4623_v6 = vld [vmem:[#allocation2 + $0x8] ss:$16 sps:$4 sm:$0xff]  }
 0x15d   :  { %1788 = vmatprep.subr.bf16.mxu1 %v4904_v22 }
 0x15f   :  { %1556 = vmatmul.mubr.bf16.gmra.mrb[60].mxu1 %v4547_v57  ;;  %v4605_v57 = vld [vmem:[#allocation2 + $0x344] ss:$16 sps:$4 sm:$0xff]  }
 0x160   :  { %1563 = vmatprep.mubr.bf16.mxu1 %v4548_v59  ;;  %1789 = vmatpush1.bf16.msra.mxu1 %v824_v16  ;;  %v4608_v59 = vld [vmem:[#allocation2 + $0x364] ss:$16 sps:$4 sm:$0xff]   ;;  %v4640_v16 = vld [vmem:[#allocation2 + $0xa8] ss:$16 sps:$4 sm:$0xff]  }
 0x161   :  { %1790 = vmatprep.subr.bf16.mxu1 %v4904_v22 }
 0x164   :  { %1791 = vmatpush1.bf16.msra.mxu1 %v825_v14  ;;  %v4637_v14 = vld [vmem:[#allocation2 + $0x88] ss:$16 sps:$4 sm:$0xff]  }
 0x165   :  { %1792 = vmatprep.subr.bf16.mxu1 %v4904_v22 }
 0x167   :  { %1564 = vmatmul.mubr.bf16.gmra.mrb[64].mxu1 %v4550_v1  ;;  %v4617_v1 = vld [vmem:[#allocation2 + $0x3c4] ss:$16 sps:$4 sm:$0xff]  }
 0x168   :  { %1571 = vmatprep.mubr.bf16.mxu1 %v4551_v3  ;;  %1793 = vmatpush1.bf16.msra.mxu1 %v826_v25  ;;  %v4620_v3 = vld [vmem:[#allocation2 + $0x3e4] ss:$16 sps:$4 sm:$0xff]  }
 0x169   :  { %1794 = vmatprep.subr.bf16.mxu1 %v4904_v22  ;;  %v4698_v25 = vld [vmem:[%s5493_s4] sm:$0xff]  }
 0x16a   :  { %3981 = vmatprep.subr.bf16.mxu0 %v4698_v25 }
 0x16b   :  { %3982 = vmatpush3.bf16.msra.mxu0 %v4698_v25 }
 0x16c   :  { %1795 = vmatpush1.bf16.msra.mxu1 %v827_v23  ;;  %v4649_v23 = vld [vmem:[#allocation2 + $0x108] ss:$16 sps:$4 sm:$0xff]  }
 0x16f   :  { %1572 = vmatmul.mubr.bf16.gmra.mrb[68].mxu1 %v4553_v9  ;;  %v4629_v9 = vld [vmem:[#allocation2 + $0x4c] ss:$16 sps:$4 sm:$0xff]  }
 0x170   :  { %1579 = vmatprep.mubr.bf16.mxu1 %v4554_v11  ;;  %v4632_v11 = vld [vmem:[#allocation2 + $0x6c] ss:$16 sps:$4 sm:$0xff]  }
 0x177   :  { %1580 = vmatmul.mubr.bf16.gmra.mrb[72].mxu1 %v4556_v17  ;;  %v4641_v17 = vld [vmem:[#allocation2 + $0xcc] ss:$16 sps:$4 sm:$0xff]  }
 0x178   :  { %1587 = vmatprep.mubr.bf16.mxu1 %v4557_v19  ;;  %v4644_v19 = vld [vmem:[#allocation2 + $0xec] ss:$16 sps:$4 sm:$0xff]  }
 0x17f   :  { %1588 = vmatmul.mubr.bf16.gmra.mrb[76].mxu1 %v4559_v26  ;;  %v4652_v26 = vld [vmem:[#allocation2 + $0x128] ss:$16 sps:$4 sm:$0xff]  }
 0x180   :  { %1595 = vmatprep.mubr.bf16.mxu1 %v4560_v27  ;;  %v4653_v27 = vld [vmem:[#allocation2 + $0x14c] ss:$16 sps:$4 sm:$0xff]  }
 0x187   :  { %1596 = vmatmul.mubr.bf16.gmra.mrb[80].mxu1 %v4562_v28  ;;  %v4702_v28 = vld [vmem:[%s5493_s4 + $0x8] sm:$0xff]  }
 0x188   :  { %1603 = vmatprep.mubr.bf16.mxu1 %v4563_v29  ;;  %3983 = vmatprep.subr.bf16.mxu0 %v4702_v28  ;;  %v4703_v29 = vld [vmem:[%s5493_s4 + $0x10] sm:$0xff]  }
 0x189   :  { %3984 = vmatpush3.bf16.msra.mxu0 %v4702_v28 }
 0x18a   :  { %3985 = vmatprep.subr.bf16.mxu0 %v4703_v29 }
 0x18d   :  { %3986 = vmatpush3.bf16.msra.mxu0 %v4703_v29 }
 0x18f   :  { %1604 = vmatmul.mubr.bf16.gmra.mrb[84].mxu1 %v4565_v30  ;;  %v4655_v30 = vld [vmem:[#allocation2 + $0x148] ss:$16 sps:$4 sm:$0xff]  }
 0x190   :  { %1611 = vmatprep.mubr.bf16.mxu1 %v4566_v31  ;;  %v4656_v31 = vld [vmem:[#allocation2 + $0x16c] ss:$16 sps:$4 sm:$0xff]  }
 0x197   :  { %1612 = vmatmul.mubr.bf16.gmra.mrb[88].mxu1 %v4568_v32  ;;  %v4707_v32 = vld [vmem:[%s5493_s4 + $0x18] sm:$0xff]  }
 0x198   :  { %1619 = vmatprep.mubr.bf16.mxu1 %v4569_v33  ;;  %3987 = vmatprep.subr.bf16.mxu0 %v4707_v32  ;;  %v4708_v33 = vld [vmem:[%s5493_s4 + $0x20] sm:$0xff]  }
 0x199   :  { %3988 = vmatpush3.bf16.msra.mxu0 %v4707_v32  ;;  %v4720_v32 = vld [vmem:[#allocation2 + $0x3a8] ss:$16 sps:$4 sm:$0xff]  }
 0x19a   :  { %3989 = vmatprep.subr.bf16.mxu0 %v4708_v33 }
 0x19d   :  { %3990 = vmatpush3.bf16.msra.mxu0 %v4708_v33 }
 0x19f   :  { %1620 = vmatmul.mubr.bf16.gmra.mrb[92].mxu1 %v4571_v34  ;;  %v4658_v34 = vld [vmem:[#allocation2 + $0x168] ss:$16 sps:$4 sm:$0xff]  }
 0x1a0   :  { %1627 = vmatprep.mubr.bf16.mxu1 %v4572_v35  ;;  %v4659_v35 = vld [vmem:[#allocation2 + $0x18c] ss:$16 sps:$4 sm:$0xff]  }
 0x1a7   :  { %1628 = vmatmul.mubr.bf16.gmra.mrb[96].mxu1 %v4574_v36  ;;  %v4712_v36 = vld [vmem:[%s5493_s4 + $0x28] sm:$0xff]  }
 0x1a8   :  { %1635 = vmatprep.mubr.bf16.mxu1 %v4575_v37  ;;  %3991 = vmatprep.subr.bf16.mxu0 %v4712_v36  ;;  %v4713_v37 = vld [vmem:[%s5493_s4 + $0x30] sm:$0xff]  }
 0x1a9   :  { %3992 = vmatpush3.bf16.msra.mxu0 %v4712_v36 }
 0x1aa   :  { %3993 = vmatprep.subr.bf16.mxu0 %v4713_v37 }
 0x1ad   :  { %3994 = vmatpush3.bf16.msra.mxu0 %v4713_v37 }
 0x1af   :  { %1636 = vmatmul.mubr.bf16.gmra.mrb[100].mxu1 %v4577_v38  ;;  %v4661_v38 = vld [vmem:[#allocation2 + $0x188] ss:$16 sps:$4 sm:$0xff]  }
 0x1b0   :  { %1643 = vmatprep.mubr.bf16.mxu1 %v4578_v39  ;;  %v4662_v39 = vld [vmem:[#allocation2 + $0x1ac] ss:$16 sps:$4 sm:$0xff]  }
 0x1b7   :  { %1644 = vmatmul.mubr.bf16.gmra.mrb[104].mxu1 %v4580_v40  ;;  %v4717_v40 = vld [vmem:[%s5493_s4 + $0x38] sm:$0xff]  }
 0x1b8   :  { %1651 = vmatprep.mubr.bf16.mxu1 %v4581_v41  ;;  %3995 = vmatprep.subr.bf16.mxu0 %v4717_v40  ;;  %v4664_v41 = vld [vmem:[#allocation2 + $0x1a8] ss:$16 sps:$4 sm:$0xff]  }
 0x1b9   :  { %3996 = vmatpush3.bf16.msra.mxu0 %v4717_v40 }
 0x1ba   :  { %2541 = vmatprep.subr.bf16.mxu0 %v4904_v22 }
 0x1bf   :  { %1652 = vmatmul.mubr.bf16.gmra.mrb[108].mxu1 %v4583_v42  ;;  %v4665_v42 = vld [vmem:[#allocation2 + $0x1cc] ss:$16 sps:$4 sm:$0xff]  }
 0x1c0   :  { %1659 = vmatprep.mubr.bf16.mxu1 %v4584_v43  ;;  %v4667_v43 = vld [vmem:[#allocation2 + $0x1c8] ss:$16 sps:$4 sm:$0xff]  }
 0x1c7   :  { %1660 = vmatmul.mubr.bf16.gmra.mrb[112].mxu1 %v4586_v44  ;;  %v4668_v44 = vld [vmem:[#allocation2 + $0x1ec] ss:$16 sps:$4 sm:$0xff]  }
 0x1c8   :  { %1667 = vmatprep.mubr.bf16.mxu1 %v4587_v45  ;;  %v4670_v45 = vld [vmem:[#allocation2 + $0x1e8] ss:$16 sps:$4 sm:$0xff]  }
 0x1cf   :  { %1668 = vmatmul.mubr.bf16.gmra.mrb[116].mxu1 %v4589_v46  ;;  %v4671_v46 = vld [vmem:[#allocation2 + $0x20c] ss:$16 sps:$4 sm:$0xff]  }
 0x1d0   :  { %1675 = vmatprep.mubr.bf16.mxu1 %v4590_v47  ;;  %v4673_v47 = vld [vmem:[#allocation2 + $0x208] ss:$16 sps:$4 sm:$0xff]  }
 0x1d7   :  { %1676 = vmatmul.mubr.bf16.gmra.mrb[120].mxu1 %v4592_v48  ;;  %v4674_v48 = vld [vmem:[#allocation2 + $0x22c] ss:$16 sps:$4 sm:$0xff]  }
 0x1d8   :  { %1683 = vmatprep.mubr.bf16.mxu1 %v4593_v49  ;;  %v4676_v49 = vld [vmem:[#allocation2 + $0x228] ss:$16 sps:$4 sm:$0xff]  }
 0x1df   :  { %1684 = vmatmul.mubr.bf16.gmra.mrb[124].mxu1 %v4595_v50  ;;  %v4677_v50 = vld [vmem:[#allocation2 + $0x24c] ss:$16 sps:$4 sm:$0xff]  }
 0x1e0   :  { %1691 = vmatprep.mubr.bf16.mxu1 %v4596_v51  ;;  %v4679_v51 = vld [vmem:[#allocation2 + $0x248] ss:$16 sps:$4 sm:$0xff]  }
 0x1e7   :  { %1692 = vmatmul.mubr.bf16.gmra.mrb[128].mxu1 %v4598_v52  ;;  %v4680_v52 = vld [vmem:[#allocation2 + $0x26c] ss:$16 sps:$4 sm:$0xff]  }
 0x1e8   :  { %1699 = vmatprep.mubr.bf16.mxu1 %v4599_v53  ;;  %v4682_v53 = vld [vmem:[#allocation2 + $0x268] ss:$16 sps:$4 sm:$0xff]  }
 0x1ef   :  { %1700 = vmatmul.mubr.bf16.gmra.mrb[132].mxu1 %v4601_v54  ;;  %v4683_v54 = vld [vmem:[#allocation2 + $0x28c] ss:$16 sps:$4 sm:$0xff]  }
 0x1f0   :  { %1707 = vmatprep.mubr.bf16.mxu1 %v4602_v55  ;;  %v4685_v55 = vld [vmem:[#allocation2 + $0x288] ss:$16 sps:$4 sm:$0xff]  }
 0x1f7   :  { %1708 = vmatmul.mubr.bf16.gmra.mrb[136].mxu1 %v4604_v56  ;;  %v4686_v56 = vld [vmem:[#allocation2 + $0x2ac] ss:$16 sps:$4 sm:$0xff]  }
 0x1f8   :  { %1715 = vmatprep.mubr.bf16.mxu1 %v4605_v57  ;;  %v4688_v57 = vld [vmem:[#allocation2 + $0x2a8] ss:$16 sps:$4 sm:$0xff]  }
 0x1ff   :  { %1716 = vmatmul.mubr.bf16.gmra.mrb[140].mxu1 %v4607_v58  ;;  %v4689_v58 = vld [vmem:[#allocation2 + $0x2cc] ss:$16 sps:$4 sm:$0xff]  }
 0x200   :  { %1723 = vmatprep.mubr.bf16.mxu1 %v4608_v59  ;;  %v4691_v59 = vld [vmem:[#allocation2 + $0x2c8] ss:$16 sps:$4 sm:$0xff]  }
 0x207   :  { %1724 = vmatmul.mubr.bf16.gmra.mrb[144].mxu1 %v4610_v60  ;;  %v4692_v60 = vld [vmem:[#allocation2 + $0x2ec] ss:$16 sps:$4 sm:$0xff]  }
 0x208   :  { %1731 = vmatprep.mubr.bf16.mxu1 %v4611_v61  ;;  %v4694_v61 = vld [vmem:[#allocation2 + $0x2e8] ss:$16 sps:$4 sm:$0xff]  }
 0x20f   :  { %1732 = vmatmul.mubr.bf16.gmra.mrb[148].mxu1 %v4613_v62  ;;  %v4695_v62 = vld [vmem:[#allocation2 + $0x30c] ss:$16 sps:$4 sm:$0xff]  }
 0x210   :  { %1739 = vmatprep.mubr.bf16.mxu1 %v4614_v63  ;;  %v4697_v63 = vld [vmem:[#allocation2 + $0x308] ss:$16 sps:$4 sm:$0xff]  }
 0x217   :  { %1740 = vmatmul.mubr.bf16.gmra.mrb[152].mxu1 %v4616_v0  ;;  %v4699_v0 = vld [vmem:[#allocation2 + $0x32c] ss:$16 sps:$4 sm:$0xff]  }
 0x218   :  { %1747 = vmatprep.mubr.bf16.mxu1 %v4617_v1  ;;  %v4701_v1 = vld [vmem:[#allocation2 + $0x328] ss:$16 sps:$4 sm:$0xff]  }
 0x21f   :  { %1748 = vmatmul.mubr.bf16.gmra.mrb[156].mxu1 %v4619_v2  ;;  %v4704_v2 = vld [vmem:[#allocation2 + $0x34c] ss:$16 sps:$4 sm:$0xff]  }
 0x220   :  { %1755 = vmatprep.mubr.bf16.mxu1 %v4620_v3  ;;  %v4706_v3 = vld [vmem:[#allocation2 + $0x348] ss:$16 sps:$4 sm:$0xff]  }
 0x227   :  { %1756 = vmatmul.mubr.bf16.gmra.mrb[160].mxu1 %v4622_v4  ;;  %v4709_v4 = vld [vmem:[#allocation2 + $0x36c] ss:$16 sps:$4 sm:$0xff]  }
 0x228   :  { %1796 = vmatprep.mubr.bf16.mxu1 %v4625_v5  ;;  %v5185_v5 = vld [vmem:[%s5492_s3] ss:$0 sm:$0xff] }
 0x22f   :  { %1797 = vmatmul.mubr.bf16.vlgmr.msra.gmra.mrb[36].mxu1 %v4623_v6 }
 0x230   :  { %1804 = vmatprep.mubr.bf16.mxu1 %v4626_v7 }
 0x237   :  { %1805 = vmatmul.mubr.bf16.gmra.mrb[40].mxu1 %v4628_v8 }
 0x238   :  { %1812 = vmatprep.mubr.bf16.mxu1 %v4629_v9  ;;  %v4711_v9 = vld [vmem:[#allocation2 + $0x368] ss:$16 sps:$4 sm:$0xff]  }
 0x23f   :  { %1813 = vmatmul.mubr.bf16.gmra.mrb[44].mxu1 %v4631_v10 }
 0x240   :  { %1820 = vmatprep.mubr.bf16.mxu1 %v4632_v11  ;;  %v4714_v11 = vld [vmem:[#allocation2 + $0x38c] ss:$16 sps:$4 sm:$0xff]  }
 0x247   :  { %1821 = vmatmul.mubr.bf16.gmra.mrb[48].mxu1 %v4634_v12 }
 0x248   :  { %1828 = vmatprep.mubr.bf16.mxu1 %v4635_v13 }
 0x24f   :  { %1829 = vmatmul.mubr.bf16.gmra.mrb[52].mxu1 %v4637_v14 }
 0x250   :  { %1836 = vmatprep.mubr.bf16.mxu1 %v4638_v15 }
 0x257   :  { %1837 = vmatmul.mubr.bf16.gmra.mrb[56].mxu1 %v4640_v16 }
 0x258   :  { %1844 = vmatprep.mubr.bf16.mxu1 %v4641_v17 }
 0x25f   :  { %1845 = vmatmul.mubr.bf16.gmra.mrb[60].mxu1 %v4643_v18 }
 0x260   :  { %1852 = vmatprep.mubr.bf16.mxu1 %v4644_v19 }
 0x267   :  { %1853 = vmatmul.mubr.bf16.gmra.mrb[64].mxu1 %v4646_v20  ;;  %v4716_v20 = vld [vmem:[#allocation2 + $0x388] ss:$16 sps:$4 sm:$0xff]  }
 0x268   :  { %1860 = vmatprep.mubr.bf16.mxu1 %v4647_v21 }
 0x26f   :  { %1861 = vmatmul.mubr.bf16.gmra.mrb[68].mxu1 %v4649_v23  ;;  %v4718_v23 = vld [vmem:[#allocation2 + $0x3ac] ss:$16 sps:$4 sm:$0xff]  }
 0x270   :  { %1868 = vmatprep.mubr.bf16.mxu1 %v4650_v24 }
 0x277   :  { %1869 = vmatmul.mubr.bf16.gmra.mrb[72].mxu1 %v4652_v26 }
 0x278   :  { %1876 = vmatprep.mubr.bf16.mxu1 %v4653_v27 }
 0x27f   :  { %1877 = vmatmul.mubr.bf16.gmra.mrb[76].mxu1 %v4655_v30 }
 0x280   :  { %1884 = vmatprep.mubr.bf16.mxu1 %v4656_v31 }
 0x287   :  { %1885 = vmatmul.mubr.bf16.gmra.mrb[80].mxu1 %v4658_v34  ;;  %v4721_v34 = vld [vmem:[#allocation2 + $0x3cc] ss:$16 sps:$4 sm:$0xff]  }
 0x288   :  { %1892 = vmatprep.mubr.bf16.mxu1 %v4659_v35 }
 0x28f   :  { %1893 = vmatmul.mubr.bf16.gmra.mrb[84].mxu1 %v4661_v38 }
 0x290   :  { %1900 = vmatprep.mubr.bf16.mxu1 %v4662_v39 }
 0x297   :  { %1901 = vmatmul.mubr.bf16.gmra.mrb[88].mxu1 %v4664_v41 }
 0x298   :  { %1908 = vmatprep.mubr.bf16.mxu1 %v4665_v42 }
 0x29f   :  { %1909 = vmatmul.mubr.bf16.gmra.mrb[92].mxu1 %v4667_v43  ;;  %v4723_v43 = vld [vmem:[#allocation2 + $0x3c8] ss:$16 sps:$4 sm:$0xff]  }
 0x2a0   :  { %1916 = vmatprep.mubr.bf16.mxu1 %v4668_v44 }
 0x2a7   :  { %1917 = vmatmul.mubr.bf16.gmra.mrb[96].mxu1 %v4670_v45  ;;  %v4724_v45 = vld [vmem:[#allocation2 + $0x3ec] ss:$16 sps:$4 sm:$0xff]  }
 0x2a8   :  { %1924 = vmatprep.mubr.bf16.mxu1 %v4671_v46 }
 0x2af   :  { %1925 = vmatmul.mubr.bf16.gmra.mrb[100].mxu1 %v4673_v47 }
 0x2b0   :  { %1932 = vmatprep.mubr.bf16.mxu1 %v4674_v48 }
 0x2b7   :  { %1933 = vmatmul.mubr.bf16.gmra.mrb[104].mxu1 %v4676_v49 }
 0x2b8   :  { %1940 = vmatprep.mubr.bf16.mxu1 %v4677_v50 }
 0x2bf   :  { %1941 = vmatmul.mubr.bf16.gmra.mrb[108].mxu1 %v4679_v51 }
 0x2c0   :  { %1948 = vmatprep.mubr.bf16.mxu1 %v4680_v52 }
 0x2c7   :  { %1949 = vmatmul.mubr.bf16.gmra.mrb[112].mxu1 %v4682_v53 }
 0x2c8   :  { %1956 = vmatprep.mubr.bf16.mxu1 %v4683_v54  ;;  %v4726_v54 = vld [vmem:[#allocation2 + $0x3e8] ss:$16 sps:$4 sm:$0xff]  }
 0x2cf   :  { %1957 = vmatmul.mubr.bf16.gmra.mrb[116].mxu1 %v4685_v55 }
 0x2d0   :  { %1964 = vmatprep.mubr.bf16.mxu1 %v4686_v56 }
 0x2d7   :  { %1965 = vmatmul.mubr.bf16.gmra.mrb[120].mxu1 %v4688_v57 }
 0x2d8   :  { %1972 = vmatprep.mubr.bf16.mxu1 %v4689_v58 }
 0x2df   :  { %1973 = vmatmul.mubr.bf16.gmra.mrb[124].mxu1 %v4691_v59 }
 0x2e0   :  { %1980 = vmatprep.mubr.bf16.mxu1 %v4692_v60 }
 0x2e7   :  { %1981 = vmatmul.mubr.bf16.gmra.mrb[128].mxu1 %v4694_v61 }
 0x2e8   :  { %1988 = vmatprep.mubr.bf16.mxu1 %v4695_v62 }
 0x2ef   :  { %1989 = vmatmul.mubr.bf16.gmra.mrb[132].mxu1 %v4697_v63 }
 0x2f0   :  { %1996 = vmatprep.mubr.bf16.mxu1 %v4699_v0 }
 0x2f7   :  { %1997 = vmatmul.mubr.bf16.gmra.mrb[136].mxu1 %v4701_v1 }
 0x2f8   :  { %2004 = vmatprep.mubr.bf16.mxu1 %v4704_v2 }
 0x2ff   :  { %2005 = vmatmul.mubr.bf16.gmra.mrb[140].mxu1 %v4706_v3 }
 0x300   :  { %2012 = vmatprep.mubr.bf16.mxu1 %v4709_v4 }
 0x302   :  { %v1798_v6 = vpop.f32.mrb[36].mxu1 }
 0x303   :  { %v4103_v7 = vadd.f32 %v5185_v5, %v1798_v6  ;;  %v1800_v8 = vpop.f32.mrb[37].mxu1 }
 0x304   :  { %v1801_v10 = vpop.f32.mrb[38].mxu1 }
 0x305   :  { %v4104_v12 = vadd.f32 %v5185_v5, %v1801_v10  ;;  %v1803_v13 = vpop.f32.mrb[39].mxu1  ;;  %v2053_v14 = vmax.f32 %v4103_v7, 0.0 }
 0x307   :  { %v2054_v15 = vmax.f32 %v4104_v12, 0.0  ;;  %2013 = vmatmul.mubr.bf16.gmra.mrb[144].mxu1 %v4711_v9 }
 0x308   :  { %2020 = vmatprep.mubr.bf16.mxu1 %v4714_v11 }
 0x309   :  { %v2117_v16 = vpack.c.bf16 %v2054_v15, %v2053_v14 }
 0x30a   :  { %v1806_v17 = vpop.f32.mrb[40].mxu1 }
 0x30b   :  { %v4105_v18 = vadd.f32 %v5185_v5, %v1806_v17  ;;  %v1808_v19 = vpop.f32.mrb[41].mxu1  ;;  %3997 = vmatprep.mubr.bf16.mxu0 %v2117_v16 }
 0x30c   :  { %v1809_v21 = vpop.f32.mrb[42].mxu1 }
 0x30d   :  { %v4106_v24 = vadd.f32 %v5185_v5, %v1809_v21  ;;  %v1811_v25 = vpop.f32.mrb[43].mxu1  ;;  %v2055_v26 = vmax.f32 %v4105_v18, 0.0 }
 0x30f   :  { %v2056_v27 = vmax.f32 %v4106_v24, 0.0  ;;  %2021 = vmatmul.mubr.bf16.gmra.mrb[148].mxu1 %v4716_v20 }
 0x310   :  { %2028 = vmatprep.mubr.bf16.mxu1 %v4718_v23 }
 0x311   :  { %v2118_v28 = vpack.c.bf16 %v2056_v27, %v2055_v26 }
 0x312   :  { %v1814_v29 = vpop.f32.mrb[44].mxu1 }
 0x313   :  { %v4107_v30 = vadd.f32 %v5185_v5, %v1814_v29  ;;  %v1816_v31 = vpop.f32.mrb[45].mxu1  ;;  %3998 = vmatmul.mubr.bf16.vlgmr.msra.gmra.mrb[28].mxu0 %v2118_v28 }
 0x314   :  { %v1817_v33 = vpop.f32.mrb[46].mxu1 }
 0x315   :  { %v4108_v35 = vadd.f32 %v5185_v5, %v1817_v33  ;;  %v1819_v36 = vpop.f32.mrb[47].mxu1  ;;  %v2057_v37 = vmax.f32 %v4107_v30, 0.0 }
 0x317   :  { %v2058_v38 = vmax.f32 %v4108_v35, 0.0  ;;  %2029 = vmatmul.mubr.bf16.gmra.mrb[152].mxu1 %v4720_v32 }
 0x318   :  { %2036 = vmatprep.mubr.bf16.mxu1 %v4721_v34 }
 0x319   :  { %v2119_v39 = vpack.c.bf16 %v2058_v38, %v2057_v37 }
 0x31a   :  { %v1822_v40 = vpop.f32.mrb[48].mxu1 }
 0x31b   :  { %v4109_v41 = vadd.f32 %v5185_v5, %v1822_v40  ;;  %v1824_v42 = vpop.f32.mrb[49].mxu1  ;;  %4001 = vmatprep.mubr.bf16.mxu0 %v2119_v39 }
 0x31c   :  { %v1825_v44 = vpop.f32.mrb[50].mxu1 }
 0x31d   :  { %v4110_v46 = vadd.f32 %v5185_v5, %v1825_v44  ;;  %v1827_v47 = vpop.f32.mrb[51].mxu1  ;;  %v2059_v48 = vmax.f32 %v4109_v41, 0.0 }
 0x31f   :  { %v2060_v49 = vmax.f32 %v4110_v46, 0.0  ;;  %2037 = vmatmul.mubr.bf16.gmra.mrb[156].mxu1 %v4723_v43 }
 0x320   :  { %2044 = vmatprep.mubr.bf16.mxu1 %v4724_v45 }
 0x321   :  { %v2120_v50 = vpack.c.bf16 %v2060_v49, %v2059_v48 }
 0x322   :  { %v1830_v51 = vpop.f32.mrb[52].mxu1 }
 0x323   :  { %v4111_v52 = vadd.f32 %v5185_v5, %v1830_v51  ;;  %v1832_v53 = vpop.f32.mrb[53].mxu1  ;;  %4002 = vmatmul.mubr.bf16.gmra.mrb[32].mxu0 %v2120_v50 }
 0x324   :  { %v1833_v55 = vpop.f32.mrb[54].mxu1 }
 0x325   :  { %v4112_v56 = vadd.f32 %v5185_v5, %v1833_v55  ;;  %v1835_v57 = vpop.f32.mrb[55].mxu1  ;;  %v2061_v58 = vmax.f32 %v4111_v52, 0.0 }
 0x327   :  { %v2062_v59 = vmax.f32 %v4112_v56, 0.0  ;;  %2045 = vmatmul.mubr.bf16.gmra.mrb[160].mxu1 %v4726_v54 }
 0x329   :  { %v2121_v60 = vpack.c.bf16 %v2062_v59, %v2061_v58 }
 0x32a   :  { %v1838_v61 = vpop.f32.mrb[56].mxu1 }
 0x32b   :  { %v4113_v62 = vadd.f32 %v5185_v5, %v1838_v61  ;;  %v1840_v63 = vpop.f32.mrb[57].mxu1  ;;  %4005 = vmatprep.mubr.bf16.mxu0 %v2121_v60 }
 0x32c   :  { %v1841_v0 = vpop.f32.mrb[58].mxu1 }
 0x32d   :  { %v4114_v1 = vadd.f32 %v5185_v5, %v1841_v0  ;;  %v1843_v2 = vpop.f32.mrb[59].mxu1  ;;  %v2063_v3 = vmax.f32 %v4113_v62, 0.0 }
 0x32f   :  { %v2064_v4 = vmax.f32 %v4114_v1, 0.0 }
 0x331   :  { %v2122_v6 = vpack.c.bf16 %v2064_v4, %v2063_v3 }
 0x332   :  { %v1846_v7 = vpop.f32.mrb[60].mxu1 }
 0x333   :  { %v4115_v8 = vadd.f32 %v5185_v5, %v1846_v7  ;;  %v1848_v9 = vpop.f32.mrb[61].mxu1  ;;  %4006 = vmatmul.mubr.bf16.gmra.mrb[36].mxu0 %v2122_v6 }
 0x334   :  { %v1849_v10 = vpop.f32.mrb[62].mxu1 }
 0x335   :  { %v4116_v11 = vadd.f32 %v5185_v5, %v1849_v10  ;;  %v1851_v12 = vpop.f32.mrb[63].mxu1  ;;  %v2065_v13 = vmax.f32 %v4115_v8, 0.0 }
 0x337   :  { %v2066_v14 = vmax.f32 %v4116_v11, 0.0 }
 0x339   :  { %v2123_v15 = vpack.c.bf16 %v2066_v14, %v2065_v13 }
 0x33a   :  { %v1854_v16 = vpop.f32.mrb[64].mxu1 }
 0x33b   :  { %v4117_v17 = vadd.f32 %v5185_v5, %v1854_v16  ;;  %v1856_v18 = vpop.f32.mrb[65].mxu1  ;;  %4009 = vmatprep.mubr.bf16.mxu0 %v2123_v15 }
 0x33c   :  { %v1857_v19 = vpop.f32.mrb[66].mxu1 }
 0x33d   :  { %v4118_v20 = vadd.f32 %v5185_v5, %v1857_v19  ;;  %v1859_v21 = vpop.f32.mrb[67].mxu1  ;;  %v2067_v23 = vmax.f32 %v4117_v17, 0.0 }
 0x33f   :  { %v2068_v24 = vmax.f32 %v4118_v20, 0.0 }
 0x341   :  { %v2124_v25 = vpack.c.bf16 %v2068_v24, %v2067_v23 }
 0x342   :  { %v1862_v26 = vpop.f32.mrb[68].mxu1 }
 0x343   :  { %v4119_v27 = vadd.f32 %v5185_v5, %v1862_v26  ;;  %v1864_v28 = vpop.f32.mrb[69].mxu1  ;;  %4010 = vmatmul.mubr.bf16.gmra.mrb[40].mxu0 %v2124_v25 }
 0x344   :  { %v1865_v29 = vpop.f32.mrb[70].mxu1 }
 0x345   :  { %v4120_v30 = vadd.f32 %v5185_v5, %v1865_v29  ;;  %v1867_v31 = vpop.f32.mrb[71].mxu1  ;;  %v2069_v32 = vmax.f32 %v4119_v27, 0.0 }
 0x347   :  { %v2070_v33 = vmax.f32 %v4120_v30, 0.0 }
 0x349   :  { %v2125_v34 = vpack.c.bf16 %v2070_v33, %v2069_v32 }
 0x34a   :  { %v1870_v35 = vpop.f32.mrb[72].mxu1 }
 0x34b   :  { %v4121_v36 = vadd.f32 %v5185_v5, %v1870_v35  ;;  %v1872_v37 = vpop.f32.mrb[73].mxu1  ;;  %4013 = vmatprep.mubr.bf16.mxu0 %v2125_v34 }
 0x34c   :  { %v1873_v38 = vpop.f32.mrb[74].mxu1 }
 0x34d   :  { %v4122_v39 = vadd.f32 %v5185_v5, %v1873_v38  ;;  %v1875_v40 = vpop.f32.mrb[75].mxu1  ;;  %v2071_v41 = vmax.f32 %v4121_v36, 0.0 }
 0x34f   :  { %v2072_v42 = vmax.f32 %v4122_v39, 0.0 }
 0x351   :  { %v2126_v43 = vpack.c.bf16 %v2072_v42, %v2071_v41 }
 0x352   :  { %v1878_v44 = vpop.f32.mrb[76].mxu1 }
 0x353   :  { %v4123_v45 = vadd.f32 %v5185_v5, %v1878_v44  ;;  %v1880_v46 = vpop.f32.mrb[77].mxu1  ;;  %4014 = vmatmul.mubr.bf16.gmra.mrb[44].mxu0 %v2126_v43 }
 0x354   :  { %v1881_v47 = vpop.f32.mrb[78].mxu1 }
 0x355   :  { %v4124_v48 = vadd.f32 %v5185_v5, %v1881_v47  ;;  %v1883_v49 = vpop.f32.mrb[79].mxu1  ;;  %v2073_v50 = vmax.f32 %v4123_v45, 0.0 }
 0x357   :  { %v2074_v51 = vmax.f32 %v4124_v48, 0.0 }
 0x359   :  { %v2127_v52 = vpack.c.bf16 %v2074_v51, %v2073_v50 }
 0x35a   :  { %v1886_v53 = vpop.f32.mrb[80].mxu1 }
 0x35b   :  { %v4125_v54 = vadd.f32 %v5185_v5, %v1886_v53  ;;  %v1888_v55 = vpop.f32.mrb[81].mxu1  ;;  %4017 = vmatprep.mubr.bf16.mxu0 %v2127_v52 }
 0x35c   :  { %v1889_v56 = vpop.f32.mrb[82].mxu1 }
 0x35d   :  { %v4126_v57 = vadd.f32 %v5185_v5, %v1889_v56  ;;  %v1891_v58 = vpop.f32.mrb[83].mxu1  ;;  %v2075_v59 = vmax.f32 %v4125_v54, 0.0 }
 0x35f   :  { %v2076_v60 = vmax.f32 %v4126_v57, 0.0 }
 0x361   :  { %v2128_v61 = vpack.c.bf16 %v2076_v60, %v2075_v59 }
 0x362   :  { %v1894_v62 = vpop.f32.mrb[84].mxu1 }
 0x363   :  { %v4127_v63 = vadd.f32 %v5185_v5, %v1894_v62  ;;  %v1896_v0 = vpop.f32.mrb[85].mxu1  ;;  %4018 = vmatmul.mubr.bf16.gmra.mrb[48].mxu0 %v2128_v61 }
 0x364   :  { %v1897_v1 = vpop.f32.mrb[86].mxu1 }
 0x365   :  { %v4128_v2 = vadd.f32 %v5185_v5, %v1897_v1  ;;  %v1899_v3 = vpop.f32.mrb[87].mxu1  ;;  %v2077_v4 = vmax.f32 %v4127_v63, 0.0 }
 0x367   :  { %v2078_v6 = vmax.f32 %v4128_v2, 0.0 }
 0x369   :  { %v2129_v7 = vpack.c.bf16 %v2078_v6, %v2077_v4 }
 0x36a   :  { %v1902_v8 = vpop.f32.mrb[88].mxu1 }
 0x36b   :  { %v4129_v9 = vadd.f32 %v5185_v5, %v1902_v8  ;;  %v1904_v10 = vpop.f32.mrb[89].mxu1  ;;  %4021 = vmatprep.mubr.bf16.mxu0 %v2129_v7 }
 0x36c   :  { %v1905_v11 = vpop.f32.mrb[90].mxu1 }
 0x36d   :  { %v4130_v12 = vadd.f32 %v5185_v5, %v1905_v11  ;;  %v1907_v13 = vpop.f32.mrb[91].mxu1  ;;  %v2079_v14 = vmax.f32 %v4129_v9, 0.0 }
 0x36f   :  { %v2080_v15 = vmax.f32 %v4130_v12, 0.0 }
 0x371   :  { %v2130_v16 = vpack.c.bf16 %v2080_v15, %v2079_v14 }
 0x372   :  { %v1910_v17 = vpop.f32.mrb[92].mxu1 }
 0x373   :  { %v4131_v18 = vadd.f32 %v5185_v5, %v1910_v17  ;;  %v1912_v19 = vpop.f32.mrb[93].mxu1  ;;  %4022 = vmatmul.mubr.bf16.gmra.mrb[52].mxu0 %v2130_v16 }
 0x374   :  { %v1913_v20 = vpop.f32.mrb[94].mxu1 }
 0x375   :  { %v4132_v21 = vadd.f32 %v5185_v5, %v1913_v20  ;;  %v1915_v23 = vpop.f32.mrb[95].mxu1  ;;  %v2081_v24 = vmax.f32 %v4131_v18, 0.0 }
 0x377   :  { %v2082_v25 = vmax.f32 %v4132_v21, 0.0 }
 0x379   :  { %v2131_v26 = vpack.c.bf16 %v2082_v25, %v2081_v24 }
 0x37a   :  { %v1918_v27 = vpop.f32.mrb[96].mxu1 }
 0x37b   :  { %v4133_v28 = vadd.f32 %v5185_v5, %v1918_v27  ;;  %v1920_v29 = vpop.f32.mrb[97].mxu1  ;;  %4025 = vmatprep.mubr.bf16.mxu0 %v2131_v26 }
 0x37c   :  { %v1921_v30 = vpop.f32.mrb[98].mxu1 }
 0x37d   :  { %v4134_v31 = vadd.f32 %v5185_v5, %v1921_v30  ;;  %v1923_v32 = vpop.f32.mrb[99].mxu1  ;;  %v2083_v33 = vmax.f32 %v4133_v28, 0.0 }
 0x37f   :  { %v2084_v34 = vmax.f32 %v4134_v31, 0.0 }
 0x381   :  { %v2132_v35 = vpack.c.bf16 %v2084_v34, %v2083_v33 }
 0x382   :  { %v1926_v36 = vpop.f32.mrb[100].mxu1 }
 0x383   :  { %v4135_v37 = vadd.f32 %v5185_v5, %v1926_v36  ;;  %v1928_v38 = vpop.f32.mrb[101].mxu1  ;;  %4026 = vmatmul.mubr.bf16.gmra.mrb[56].mxu0 %v2132_v35 }
 0x384   :  { %v1929_v39 = vpop.f32.mrb[102].mxu1 }
 0x385   :  { %v4136_v40 = vadd.f32 %v5185_v5, %v1929_v39  ;;  %v1931_v41 = vpop.f32.mrb[103].mxu1  ;;  %v2085_v42 = vmax.f32 %v4135_v37, 0.0 }
 0x387   :  { %v2086_v43 = vmax.f32 %v4136_v40, 0.0 }
 0x389   :  { %v2133_v44 = vpack.c.bf16 %v2086_v43, %v2085_v42 }
 0x38a   :  { %v1934_v45 = vpop.f32.mrb[104].mxu1 }
 0x38b   :  { %v4137_v46 = vadd.f32 %v5185_v5, %v1934_v45  ;;  %v1936_v47 = vpop.f32.mrb[105].mxu1  ;;  %4029 = vmatprep.mubr.bf16.mxu0 %v2133_v44 }
 0x38c   :  { %v1937_v48 = vpop.f32.mrb[106].mxu1 }
 0x38d   :  { %v4138_v49 = vadd.f32 %v5185_v5, %v1937_v48  ;;  %v1939_v50 = vpop.f32.mrb[107].mxu1  ;;  %v2087_v51 = vmax.f32 %v4137_v46, 0.0 }
 0x38f   :  { %v2088_v52 = vmax.f32 %v4138_v49, 0.0 }
 0x391   :  { %v2134_v53 = vpack.c.bf16 %v2088_v52, %v2087_v51 }
 0x392   :  { %v1942_v54 = vpop.f32.mrb[108].mxu1 }
 0x393   :  { %v4139_v55 = vadd.f32 %v5185_v5, %v1942_v54  ;;  %v1944_v56 = vpop.f32.mrb[109].mxu1  ;;  %4030 = vmatmul.mubr.bf16.gmra.mrb[60].mxu0 %v2134_v53 }
 0x394   :  { %v1945_v57 = vpop.f32.mrb[110].mxu1 }
 0x395   :  { %v4140_v58 = vadd.f32 %v5185_v5, %v1945_v57  ;;  %v1947_v59 = vpop.f32.mrb[111].mxu1  ;;  %v2089_v60 = vmax.f32 %v4139_v55, 0.0 }
 0x397   :  { %v2090_v61 = vmax.f32 %v4140_v58, 0.0 }
 0x399   :  { %v2135_v62 = vpack.c.bf16 %v2090_v61, %v2089_v60 }
 0x39a   :  { %v1950_v63 = vpop.f32.mrb[112].mxu1 }
 0x39b   :  { %v4141_v0 = vadd.f32 %v5185_v5, %v1950_v63  ;;  %v1952_v1 = vpop.f32.mrb[113].mxu1  ;;  %4033 = vmatprep.mubr.bf16.mxu0 %v2135_v62 }
 0x39c   :  { %v1953_v2 = vpop.f32.mrb[114].mxu1 }
 0x39d   :  { %v4142_v3 = vadd.f32 %v5185_v5, %v1953_v2  ;;  %v1955_v4 = vpop.f32.mrb[115].mxu1  ;;  %v2091_v6 = vmax.f32 %v4141_v0, 0.0 }
 0x39f   :  { %v2092_v7 = vmax.f32 %v4142_v3, 0.0 }
 0x3a1   :  { %v2136_v8 = vpack.c.bf16 %v2092_v7, %v2091_v6 }
 0x3a2   :  { %v1958_v9 = vpop.f32.mrb[116].mxu1 }
 0x3a3   :  { %v4143_v10 = vadd.f32 %v5185_v5, %v1958_v9  ;;  %v1960_v11 = vpop.f32.mrb[117].mxu1  ;;  %4034 = vmatmul.mubr.bf16.gmra.mrb[64].mxu0 %v2136_v8 }
 0x3a4   :  { %v1961_v12 = vpop.f32.mrb[118].mxu1 }
 0x3a5   :  { %v4144_v13 = vadd.f32 %v5185_v5, %v1961_v12  ;;  %v1963_v14 = vpop.f32.mrb[119].mxu1  ;;  %v2093_v15 = vmax.f32 %v4143_v10, 0.0 }
 0x3a7   :  { %v2094_v16 = vmax.f32 %v4144_v13, 0.0 }
 0x3a9   :  { %v2137_v17 = vpack.c.bf16 %v2094_v16, %v2093_v15 }
 0x3aa   :  { %v1966_v18 = vpop.f32.mrb[120].mxu1 }
 0x3ab   :  { %v4145_v19 = vadd.f32 %v5185_v5, %v1966_v18  ;;  %v1968_v20 = vpop.f32.mrb[121].mxu1  ;;  %4037 = vmatprep.mubr.bf16.mxu0 %v2137_v17 }
 0x3ac   :  { %v1969_v21 = vpop.f32.mrb[122].mxu1 }
 0x3ad   :  { %v4146_v23 = vadd.f32 %v5185_v5, %v1969_v21  ;;  %v1971_v24 = vpop.f32.mrb[123].mxu1  ;;  %v2095_v25 = vmax.f32 %v4145_v19, 0.0 }
 0x3af   :  { %v2096_v26 = vmax.f32 %v4146_v23, 0.0 }
 0x3b1   :  { %v2138_v27 = vpack.c.bf16 %v2096_v26, %v2095_v25 }
 0x3b2   :  { %v1974_v28 = vpop.f32.mrb[124].mxu1 }
 0x3b3   :  { %v4147_v29 = vadd.f32 %v5185_v5, %v1974_v28  ;;  %v1976_v30 = vpop.f32.mrb[125].mxu1  ;;  %4038 = vmatmul.mubr.bf16.gmra.mrb[68].mxu0 %v2138_v27 }
 0x3b4   :  { %v1977_v31 = vpop.f32.mrb[126].mxu1 }
 0x3b5   :  { %v4148_v32 = vadd.f32 %v5185_v5, %v1977_v31  ;;  %v1979_v33 = vpop.f32.mrb[127].mxu1  ;;  %v2097_v34 = vmax.f32 %v4147_v29, 0.0 }
 0x3b7   :  { %v2098_v35 = vmax.f32 %v4148_v32, 0.0 }
 0x3b9   :  { %v2139_v36 = vpack.c.bf16 %v2098_v35, %v2097_v34 }
 0x3ba   :  { %v1982_v37 = vpop.f32.mrb[128].mxu1 }
 0x3bb   :  { %v4149_v38 = vadd.f32 %v5185_v5, %v1982_v37  ;;  %v1984_v39 = vpop.f32.mrb[129].mxu1  ;;  %4041 = vmatprep.mubr.bf16.mxu0 %v2139_v36 }
 0x3bc   :  { %v1985_v40 = vpop.f32.mrb[130].mxu1 }
 0x3bd   :  { %v4150_v41 = vadd.f32 %v5185_v5, %v1985_v40  ;;  %v1987_v42 = vpop.f32.mrb[131].mxu1  ;;  %v2099_v43 = vmax.f32 %v4149_v38, 0.0 }
 0x3bf   :  { %v2100_v44 = vmax.f32 %v4150_v41, 0.0 }
 0x3c1   :  { %v2140_v45 = vpack.c.bf16 %v2100_v44, %v2099_v43 }
 0x3c2   :  { %v1990_v46 = vpop.f32.mrb[132].mxu1 }
 0x3c3   :  { %v4151_v47 = vadd.f32 %v5185_v5, %v1990_v46  ;;  %v1992_v48 = vpop.f32.mrb[133].mxu1  ;;  %4042 = vmatmul.mubr.bf16.gmra.mrb[72].mxu0 %v2140_v45 }
 0x3c4   :  { %v1993_v49 = vpop.f32.mrb[134].mxu1 }
 0x3c5   :  { %v4152_v50 = vadd.f32 %v5185_v5, %v1993_v49  ;;  %v1995_v51 = vpop.f32.mrb[135].mxu1  ;;  %v2101_v52 = vmax.f32 %v4151_v47, 0.0 }
 0x3c7   :  { %v2102_v53 = vmax.f32 %v4152_v50, 0.0 }
 0x3c9   :  { %v2141_v54 = vpack.c.bf16 %v2102_v53, %v2101_v52 }
 0x3ca   :  { %v1998_v55 = vpop.f32.mrb[136].mxu1 }
 0x3cb   :  { %v4153_v56 = vadd.f32 %v5185_v5, %v1998_v55  ;;  %v2000_v57 = vpop.f32.mrb[137].mxu1  ;;  %4045 = vmatprep.mubr.bf16.mxu0 %v2141_v54 }
 0x3cc   :  { %v2001_v58 = vpop.f32.mrb[138].mxu1 }
 0x3cd   :  { %v4154_v59 = vadd.f32 %v5185_v5, %v2001_v58  ;;  %v2003_v60 = vpop.f32.mrb[139].mxu1  ;;  %v2103_v61 = vmax.f32 %v4153_v56, 0.0 }
 0x3cf   :  { %v2104_v62 = vmax.f32 %v4154_v59, 0.0 }
 0x3d1   :  { %v2142_v63 = vpack.c.bf16 %v2104_v62, %v2103_v61 }
 0x3d2   :  { %v2006_v0 = vpop.f32.mrb[140].mxu1 }
 0x3d3   :  { %v4155_v1 = vadd.f32 %v5185_v5, %v2006_v0  ;;  %v2008_v2 = vpop.f32.mrb[141].mxu1  ;;  %4046 = vmatmul.mubr.bf16.gmra.mrb[76].mxu0 %v2142_v63 }
 0x3d4   :  { %v2009_v3 = vpop.f32.mrb[142].mxu1 }
 0x3d5   :  { %v4156_v4 = vadd.f32 %v5185_v5, %v2009_v3  ;;  %v2011_v6 = vpop.f32.mrb[143].mxu1  ;;  %v2105_v7 = vmax.f32 %v4155_v1, 0.0 }
 0x3d7   :  { %v2106_v8 = vmax.f32 %v4156_v4, 0.0  ;;  %v4749_v4 = vld [vmem:[#allocation2 + $0x4] ss:$16 sps:$4 sm:$0xff]  }
 0x3d9   :  { %v2143_v9 = vpack.c.bf16 %v2106_v8, %v2105_v7 }
 0x3da   :  { %v2014_v10 = vpop.f32.mrb[144].mxu1 }
 0x3db   :  { %v4157_v11 = vadd.f32 %v5185_v5, %v2014_v10  ;;  %v2016_v12 = vpop.f32.mrb[145].mxu1  ;;  %4049 = vmatprep.mubr.bf16.mxu0 %v2143_v9 }
 0x3dc   :  { %v2017_v13 = vpop.f32.mrb[146].mxu1 }
 0x3dd   :  { %v4158_v14 = vadd.f32 %v5185_v5, %v2017_v13  ;;  %v2019_v15 = vpop.f32.mrb[147].mxu1  ;;  %v2107_v16 = vmax.f32 %v4157_v11, 0.0 }
 0x3df   :  { %v2108_v17 = vmax.f32 %v4158_v14, 0.0 }
 0x3e1   :  { %v2144_v18 = vpack.c.bf16 %v2108_v17, %v2107_v16 }
 0x3e2   :  { %v2022_v19 = vpop.f32.mrb[148].mxu1 }
 0x3e3   :  { %v4159_v20 = vadd.f32 %v5185_v5, %v2022_v19  ;;  %v2024_v21 = vpop.f32.mrb[149].mxu1  ;;  %4050 = vmatmul.mubr.bf16.gmra.mrb[80].mxu0 %v2144_v18 }
 0x3e4   :  { %v2025_v23 = vpop.f32.mrb[150].mxu1 }
 0x3e5   :  { %v4160_v24 = vadd.f32 %v5185_v5, %v2025_v23  ;;  %v2027_v25 = vpop.f32.mrb[151].mxu1  ;;  %v2109_v27 = vmax.f32 %v4159_v20, 0.0 }
 0x3e6   :  { %v3999_v26 = vpop.f32.mrb[28].mxu0 }
 0x3e7   :  { %v2110_v28 = vmax.f32 %v4160_v24, 0.0  ;;  %v2247_v29 = vpop.f32.mrb[29].mxu0 }
 0x3e8   :  { %v4000_v30 = vpop.f32.mrb[30].mxu0 }
 0x3e9   :  { %v2145_v31 = vpack.c.bf16 %v2110_v28, %v2109_v27  ;;  %v2503_v32 = vpack.c.bf16 %v4000_v30, %v3999_v26  ;;  %v2250_v33 = vpop.f32.mrb[31].mxu0 }
 0x3ea   :  { %v2502_v34 = vpack.c.bf16 %v2250_v33, %v2247_v29  ;;  %v2030_v35 = vpop.f32.mrb[152].mxu1 }
 0x3eb   :  { %v4161_v36 = vadd.f32 %v5185_v5, %v2030_v35  ;;  %v2032_v37 = vpop.f32.mrb[153].mxu1  ;;  %4053 = vmatprep.mubr.bf16.mxu0 %v2145_v31 }
 0x3ec   :  { %v2033_v38 = vpop.f32.mrb[154].mxu1  ;;  %2542 = vmatpush1.bf16.msra.mxu0 %v2502_v34 }
 0x3ed   :  { %v4162_v39 = vadd.f32 %v5185_v5, %v2033_v38  ;;  %v2035_v40 = vpop.f32.mrb[155].mxu1  ;;  %2543 = vmatprep.subr.bf16.mxu0 %v4904_v22  ;;  %v2111_v41 = vmax.f32 %v4161_v36, 0.0 }
 0x3ef   :  { %v2112_v42 = vmax.f32 %v4162_v39, 0.0 }
 0x3f0   :  { %2544 = vmatpush1.bf16.msra.mxu0 %v2503_v32 }
 0x3f1   :  { %v2146_v43 = vpack.c.bf16 %v2112_v42, %v2111_v41  ;;  %2545 = vmatprep.subr.bf16.mxu0 %v4904_v22  ;;  %v4750_v42 = vld [vmem:[#allocation2] ss:$16 sps:$4 sm:$0xff]  }
 0x3f2   :  { %v2038_v44 = vpop.f32.mrb[156].mxu1 }
 0x3f3   :  { %v4163_v45 = vadd.f32 %v5185_v5, %v2038_v44  ;;  %v2040_v46 = vpop.f32.mrb[157].mxu1  ;;  %4054 = vmatmul.mubr.bf16.gmra.mrb[84].mxu0 %v2146_v43  ;;  %v4751_v43 = vld [vmem:[#allocation2 + $0x24] ss:$16 sps:$4 sm:$0xff]  }
 0x3f4   :  { %v2041_v47 = vpop.f32.mrb[158].mxu1 }
 0x3f5   :  { %v4164_v48 = vadd.f32 %v5185_v5, %v2041_v47  ;;  %v2043_v49 = vpop.f32.mrb[159].mxu1  ;;  %v2113_v51 = vmax.f32 %v4163_v45, 0.0 }
 0x3f6   :  { %v4003_v50 = vpop.f32.mrb[32].mxu0 }
 0x3f7   :  { %v2114_v52 = vmax.f32 %v4164_v48, 0.0  ;;  %v2263_v53 = vpop.f32.mrb[33].mxu0 }
 0x3f8   :  { %v4004_v54 = vpop.f32.mrb[34].mxu0 }
 0x3f9   :  { %v2147_v55 = vpack.c.bf16 %v2114_v52, %v2113_v51  ;;  %v2505_v56 = vpack.c.bf16 %v4004_v54, %v4003_v50  ;;  %v2266_v57 = vpop.f32.mrb[35].mxu0  ;;  %v4752_v50 = vld [vmem:[#allocation2 + $0x20] ss:$16 sps:$4 sm:$0xff]   ;;  %v4753_v51 = vld [vmem:[#allocation2 + $0x44] ss:$16 sps:$4 sm:$0xff]  }
 0x3fa   :  { %v2504_v58 = vpack.c.bf16 %v2266_v57, %v2263_v53  ;;  %v2046_v59 = vpop.f32.mrb[160].mxu1  ;;  %v4754_v52 = vld [vmem:[#allocation2 + $0x40] ss:$16 sps:$4 sm:$0xff]   ;;  %v4755_v53 = vld [vmem:[#allocation2 + $0x64] ss:$16 sps:$4 sm:$0xff]  }
 0x3fb   :  { %v4165_v60 = vadd.f32 %v5185_v5, %v2046_v59  ;;  %v2048_v61 = vpop.f32.mrb[161].mxu1  ;;  %4057 = vmatprep.mubr.bf16.mxu0 %v2147_v55 }
 0x3fc   :  { %v2049_v62 = vpop.f32.mrb[162].mxu1  ;;  %2546 = vmatpush1.bf16.msra.mxu0 %v2504_v58  ;;  %v4757_v61 = vld [vmem:[#allocation2 + $0x84] ss:$16 sps:$4 sm:$0xff]  }
 0x3fd   :  { %v4166_v63 = vadd.f32 %v5185_v5, %v2049_v62  ;;  %v2051_v0 = vpop.f32.mrb[163].mxu1  ;;  %2547 = vmatprep.subr.bf16.mxu0 %v4904_v22  ;;  %v2115_v1 = vmax.f32 %v4165_v60, 0.0  ;;  %v4756_v60 = vld [vmem:[#allocation2 + $0x60] ss:$16 sps:$4 sm:$0xff]  }
 0x3fe   :  { %v4758_v62 = vld [vmem:[#allocation2 + $0x80] ss:$16 sps:$4 sm:$0xff]  }
 0x3ff   :  { %v2116_v2 = vmax.f32 %v4166_v63, 0.0  ;;  %v4759_v63 = vld [vmem:[#allocation2 + $0xa4] ss:$16 sps:$4 sm:$0xff]  }
 0x400   :  { %2548 = vmatpush1.bf16.msra.mxu0 %v2505_v56 }
 0x401   :  { %v2148_v3 = vpack.c.bf16 %v2116_v2, %v2115_v1  ;;  %2549 = vmatprep.subr.bf16.mxu0 %v4904_v22 }
 0x403   :  { %4058 = vmatmul.mubr.bf16.gmra.mrb[88].mxu0 %v2148_v3 }
 0x404   :  { %2573 = vmatprep.mubr.bf16.mxu0 %v4749_v4 }
 0x406   :  { %v4007_v6 = vpop.f32.mrb[36].mxu0 }
 0x407   :  { %v2279_v7 = vpop.f32.mrb[37].mxu0 }
 0x408   :  { %v4008_v8 = vpop.f32.mrb[38].mxu0 }
 0x409   :  { %v2507_v9 = vpack.c.bf16 %v4008_v8, %v4007_v6  ;;  %v2282_v10 = vpop.f32.mrb[39].mxu0  ;;  %v4761_v8 = vld [vmem:[#allocation2 + $0xc4] ss:$16 sps:$4 sm:$0xff]  }
 0x40a   :  { %v2506_v11 = vpack.c.bf16 %v2282_v10, %v2279_v7  ;;  %v4760_v7 = vld [vmem:[#allocation2 + $0xa0] ss:$16 sps:$4 sm:$0xff]   ;;  %v4763_v10 = vld [vmem:[#allocation2 + $0xe4] ss:$16 sps:$4 sm:$0xff]  }
 0x40c   :  { %2550 = vmatpush1.bf16.msra.mxu0 %v2506_v11 }
 0x40d   :  { %2551 = vmatprep.subr.bf16.mxu0 %v4904_v22 }
 0x410   :  { %2552 = vmatpush1.bf16.msra.mxu0 %v2507_v9  ;;  %v4762_v9 = vld [vmem:[#allocation2 + $0xc0] ss:$16 sps:$4 sm:$0xff]  }
 0x411   :  { %2553 = vmatprep.subr.bf16.mxu0 %v4904_v22 }
 0x416   :  { %v4011_v5 = vpop.f32.mrb[40].mxu0 }
 0x417   :  { %v2295_v12 = vpop.f32.mrb[41].mxu0 }
 0x418   :  { %v4012_v13 = vpop.f32.mrb[42].mxu0 }
 0x419   :  { %v2509_v14 = vpack.c.bf16 %v4012_v13, %v4011_v5  ;;  %v2298_v15 = vpop.f32.mrb[43].mxu0 }
 0x41a   :  { %v2508_v16 = vpack.c.bf16 %v2298_v15, %v2295_v12 }
 0x41c   :  { %2554 = vmatpush1.bf16.msra.mxu0 %v2508_v16  ;;  %v4764_v16 = vld [vmem:[#allocation2 + $0xe0] ss:$16 sps:$4 sm:$0xff]  }
 0x41d   :  { %2555 = vmatprep.subr.bf16.mxu0 %v4904_v22 }
 0x420   :  { %2556 = vmatpush1.bf16.msra.mxu0 %v2509_v14 }
 0x421   :  { %2557 = vmatprep.subr.bf16.mxu0 %v4904_v22 }
 0x426   :  { %v4015_v17 = vpop.f32.mrb[44].mxu0 }
 0x427   :  { %v2311_v18 = vpop.f32.mrb[45].mxu0 }
 0x428   :  { %v4016_v19 = vpop.f32.mrb[46].mxu0 }
 0x429   :  { %v2511_v20 = vpack.c.bf16 %v4016_v19, %v4015_v17  ;;  %v2314_v21 = vpop.f32.mrb[47].mxu0  ;;  %v4765_v17 = vld [vmem:[#allocation2 + $0x104] ss:$16 sps:$4 sm:$0xff]  }
 0x42a   :  { %v2510_v23 = vpack.c.bf16 %v2314_v21, %v2311_v18  ;;  %v4766_v18 = vld [vmem:[#allocation2 + $0x100] ss:$16 sps:$4 sm:$0xff]   ;;  %v4767_v19 = vld [vmem:[#allocation2 + $0x124] ss:$16 sps:$4 sm:$0xff]  }
 0x42c   :  { %2558 = vmatpush1.bf16.msra.mxu0 %v2510_v23 }
 0x42d   :  { %2559 = vmatprep.subr.bf16.mxu0 %v4904_v22 }
 0x430   :  { %2560 = vmatpush1.bf16.msra.mxu0 %v2511_v20 }
 0x431   :  { %2561 = vmatprep.subr.bf16.mxu0 %v4904_v22 }
 0x436   :  { %v4019_v24 = vpop.f32.mrb[48].mxu0 }
 0x437   :  { %v2327_v25 = vpop.f32.mrb[49].mxu0 }
 0x438   :  { %v4020_v26 = vpop.f32.mrb[50].mxu0 }
 0x439   :  { %v2513_v27 = vpack.c.bf16 %v4020_v26, %v4019_v24  ;;  %v2330_v28 = vpop.f32.mrb[51].mxu0 }
 0x43a   :  { %v2512_v29 = vpack.c.bf16 %v2330_v28, %v2327_v25  ;;  %v4769_v28 = vld [vmem:[#allocation2 + $0x144] ss:$16 sps:$4 sm:$0xff]  }
 0x43c   :  { %2562 = vmatpush1.bf16.msra.mxu0 %v2512_v29  ;;  %v4770_v29 = vld [vmem:[#allocation2 + $0x140] ss:$16 sps:$4 sm:$0xff]  }
 0x43d   :  { %2563 = vmatprep.subr.bf16.mxu0 %v4904_v22 }
 0x440   :  { %2564 = vmatpush1.bf16.msra.mxu0 %v2513_v27  ;;  %v4768_v27 = vld [vmem:[#allocation2 + $0x120] ss:$16 sps:$4 sm:$0xff]  }
 0x441   :  { %2565 = vmatprep.subr.bf16.mxu0 %v4904_v22 }
 0x446   :  { %v4023_v30 = vpop.f32.mrb[52].mxu0 }
 0x447   :  { %v2343_v31 = vpop.f32.mrb[53].mxu0 }
 0x448   :  { %v4024_v32 = vpop.f32.mrb[54].mxu0 }
 0x449   :  { %v2515_v33 = vpack.c.bf16 %v4024_v32, %v4023_v30  ;;  %v2346_v34 = vpop.f32.mrb[55].mxu0  ;;  %v4771_v30 = vld [vmem:[#allocation2 + $0x164] ss:$16 sps:$4 sm:$0xff]  }
 0x44a   :  { %v2514_v35 = vpack.c.bf16 %v2346_v34, %v2343_v31 }
 0x44c   :  { %2566 = vmatpush1.bf16.msra.mxu0 %v2514_v35 }
 0x44d   :  { %2567 = vmatprep.subr.bf16.mxu0 %v4904_v22 }
 0x450   :  { %2568 = vmatpush1.bf16.msra.mxu0 %v2515_v33 }
 0x451   :  { %2569 = vmatprep.subr.bf16.mxu0 %v4904_v22 }
 0x456   :  { %v4027_v36 = vpop.f32.mrb[56].mxu0 }
 0x457   :  { %v2359_v37 = vpop.f32.mrb[57].mxu0 }
 0x458   :  { %v4028_v38 = vpop.f32.mrb[58].mxu0 }
 0x459   :  { %v2517_v39 = vpack.c.bf16 %v4028_v38, %v4027_v36  ;;  %v2362_v40 = vpop.f32.mrb[59].mxu0  ;;  %v4773_v38 = vld [vmem:[#allocation2 + $0x184] ss:$16 sps:$4 sm:$0xff]  }
 0x45a   :  { %v2516_v41 = vpack.c.bf16 %v2362_v40, %v2359_v37  ;;  %v4772_v37 = vld [vmem:[#allocation2 + $0x160] ss:$16 sps:$4 sm:$0xff]   ;;  %v4775_v40 = vld [vmem:[#allocation2 + $0x1a4] ss:$16 sps:$4 sm:$0xff]  }
 0x45c   :  { %2570 = vmatpush1.bf16.msra.mxu0 %v2516_v41 }
 0x45d   :  { %2571 = vmatprep.subr.bf16.mxu0 %v4904_v22 }
 0x460   :  { %2572 = vmatpush1.bf16.msra.mxu0 %v2517_v39  ;;  %v4774_v39 = vld [vmem:[#allocation2 + $0x180] ss:$16 sps:$4 sm:$0xff]  }
 0x461   :  { %2830 = vmatprep.subr.bf16.mxu0 %v4904_v22 }
 0x463   :  { %2574 = vmatmul.mubr.bf16.vlgmr.msra.gmra.mrb[92].mxu0 %v4750_v42 }
 0x464   :  { %2581 = vmatprep.mubr.bf16.mxu0 %v4751_v43 }
 0x466   :  { %v4031_v44 = vpop.f32.mrb[60].mxu0 }
 0x467   :  { %v2375_v45 = vpop.f32.mrb[61].mxu0 }
 0x468   :  { %v4032_v46 = vpop.f32.mrb[62].mxu0 }
 0x469   :  { %v2519_v47 = vpack.c.bf16 %v4032_v46, %v4031_v44  ;;  %v2378_v48 = vpop.f32.mrb[63].mxu0 }
 0x46a   :  { %v2518_v49 = vpack.c.bf16 %v2378_v48, %v2375_v45  ;;  %v4777_v48 = vld [vmem:[#allocation2 + $0x1c4] ss:$16 sps:$4 sm:$0xff]  }
 0x46b   :  { %2582 = vmatmul.mubr.bf16.gmra.mrb[96].mxu0 %v4752_v50  ;;  %v4779_v50 = vld [vmem:[#allocation2 + $0x1e4] ss:$16 sps:$4 sm:$0xff]  }
 0x46c   :  { %2831 = vmatpush1.bf16.msra.mxu0 %v2518_v49  ;;  %2589 = vmatprep.mubr.bf16.mxu0 %v4753_v51  ;;  %v4778_v49 = vld [vmem:[#allocation2 + $0x1c0] ss:$16 sps:$4 sm:$0xff]  }
 0x46d   :  { %2832 = vmatprep.subr.bf16.mxu0 %v4904_v22 }
 0x470   :  { %2833 = vmatpush1.bf16.msra.mxu0 %v2519_v47  ;;  %v4776_v47 = vld [vmem:[#allocation2 + $0x1a0] ss:$16 sps:$4 sm:$0xff]  }
 0x471   :  { %2834 = vmatprep.subr.bf16.mxu0 %v4904_v22 }
 0x473   :  { %2590 = vmatmul.mubr.bf16.gmra.mrb[100].mxu0 %v4754_v52 }
 0x474   :  { %2597 = vmatprep.mubr.bf16.mxu0 %v4755_v53 }
 0x476   :  { %v4035_v54 = vpop.f32.mrb[64].mxu0 }
 0x477   :  { %v2391_v55 = vpop.f32.mrb[65].mxu0 }
 0x478   :  { %v4036_v56 = vpop.f32.mrb[66].mxu0 }
 0x479   :  { %v2521_v57 = vpack.c.bf16 %v4036_v56, %v4035_v54  ;;  %v2394_v58 = vpop.f32.mrb[67].mxu0 }
 0x47a   :  { %v2520_v59 = vpack.c.bf16 %v2394_v58, %v2391_v55  ;;  %v4781_v58 = vld [vmem:[#allocation2 + $0x204] ss:$16 sps:$4 sm:$0xff]  }
 0x47b   :  { %2598 = vmatmul.mubr.bf16.gmra.mrb[104].mxu0 %v4756_v60  ;;  %v4783_v60 = vld [vmem:[#allocation2 + $0x224] ss:$16 sps:$4 sm:$0xff]  }
 0x47c   :  { %2835 = vmatpush1.bf16.msra.mxu0 %v2520_v59  ;;  %2605 = vmatprep.mubr.bf16.mxu0 %v4757_v61  ;;  %v4782_v59 = vld [vmem:[#allocation2 + $0x200] ss:$16 sps:$4 sm:$0xff]  }
 0x47d   :  { %2836 = vmatprep.subr.bf16.mxu0 %v4904_v22  ;;  %v4784_v61 = vld [vmem:[#allocation2 + $0x220] ss:$16 sps:$4 sm:$0xff]  }
 0x480   :  { %2837 = vmatpush1.bf16.msra.mxu0 %v2521_v57  ;;  %v4780_v57 = vld [vmem:[#allocation2 + $0x1e0] ss:$16 sps:$4 sm:$0xff]  }
 0x481   :  { %2838 = vmatprep.subr.bf16.mxu0 %v4904_v22 }
 0x483   :  { %2606 = vmatmul.mubr.bf16.gmra.mrb[108].mxu0 %v4758_v62  ;;  %v4785_v62 = vld [vmem:[#allocation2 + $0x244] ss:$16 sps:$4 sm:$0xff]  }
 0x484   :  { %2613 = vmatprep.mubr.bf16.mxu0 %v4759_v63  ;;  %v4786_v63 = vld [vmem:[#allocation2 + $0x240] ss:$16 sps:$4 sm:$0xff]  }
 0x486   :  { %v4039_v0 = vpop.f32.mrb[68].mxu0 }
 0x487   :  { %v2407_v1 = vpop.f32.mrb[69].mxu0 }
 0x488   :  { %v4040_v2 = vpop.f32.mrb[70].mxu0 }
 0x489   :  { %v2523_v3 = vpack.c.bf16 %v4040_v2, %v4039_v0  ;;  %v2410_v4 = vpop.f32.mrb[71].mxu0  ;;  %v4787_v0 = vld [vmem:[#allocation2 + $0x264] ss:$16 sps:$4 sm:$0xff]  }
 0x48a   :  { %v2522_v6 = vpack.c.bf16 %v2410_v4, %v2407_v1  ;;  %v4788_v1 = vld [vmem:[#allocation2 + $0x260] ss:$16 sps:$4 sm:$0xff]   ;;  %v4789_v2 = vld [vmem:[#allocation2 + $0x284] ss:$16 sps:$4 sm:$0xff]  }
 0x48b   :  { %2614 = vmatmul.mubr.bf16.gmra.mrb[112].mxu0 %v4760_v7  ;;  %v4792_v4 = vld [vmem:[#allocation2 + $0x2a0] ss:$16 sps:$4 sm:$0xff]  }
 0x48c   :  { %2839 = vmatpush1.bf16.msra.mxu0 %v2522_v6  ;;  %2621 = vmatprep.mubr.bf16.mxu0 %v4761_v8  ;;  %v4793_v6 = vld [vmem:[#allocation2 + $0x2c4] ss:$16 sps:$4 sm:$0xff]   ;;  %v4794_v7 = vld [vmem:[#allocation2 + $0x2c0] ss:$16 sps:$4 sm:$0xff]  }
 0x48d   :  { %2840 = vmatprep.subr.bf16.mxu0 %v4904_v22  ;;  %v4795_v8 = vld [vmem:[#allocation2 + $0x2e4] ss:$16 sps:$4 sm:$0xff]  }
 0x490   :  { %2841 = vmatpush1.bf16.msra.mxu0 %v2523_v3  ;;  %v4790_v3 = vld [vmem:[#allocation2 + $0x280] ss:$16 sps:$4 sm:$0xff]  }
 0x491   :  { %2842 = vmatprep.subr.bf16.mxu0 %v4904_v22 }
 0x493   :  { %2622 = vmatmul.mubr.bf16.gmra.mrb[116].mxu0 %v4762_v9  ;;  %v4796_v9 = vld [vmem:[#allocation2 + $0x2e0] ss:$16 sps:$4 sm:$0xff]  }
 0x494   :  { %2629 = vmatprep.mubr.bf16.mxu0 %v4763_v10  ;;  %v4797_v10 = vld [vmem:[#allocation2 + $0x304] ss:$16 sps:$4 sm:$0xff]  }
 0x496   :  { %v4043_v11 = vpop.f32.mrb[72].mxu0 }
 0x497   :  { %v2423_v5 = vpop.f32.mrb[73].mxu0 }
 0x498   :  { %v4044_v12 = vpop.f32.mrb[74].mxu0 }
 0x499   :  { %v2525_v13 = vpack.c.bf16 %v4044_v12, %v4043_v11  ;;  %v2426_v14 = vpop.f32.mrb[75].mxu0  ;;  %v4798_v11 = vld [vmem:[#allocation2 + $0x300] ss:$16 sps:$4 sm:$0xff]  }
 0x49a   :  { %v2524_v15 = vpack.c.bf16 %v2426_v14, %v2423_v5  ;;  %v4799_v5 = vld [vmem:[#allocation2 + $0x324] ss:$16 sps:$4 sm:$0xff]   ;;  %v4800_v12 = vld [vmem:[#allocation2 + $0x320] ss:$16 sps:$4 sm:$0xff]  }
 0x49b   :  { %2630 = vmatmul.mubr.bf16.gmra.mrb[120].mxu0 %v4764_v16  ;;  %v4802_v14 = vld [vmem:[#allocation2 + $0x340] ss:$16 sps:$4 sm:$0xff]  }
 0x49c   :  { %2843 = vmatpush1.bf16.msra.mxu0 %v2524_v15  ;;  %2637 = vmatprep.mubr.bf16.mxu0 %v4765_v17  ;;  %v4803_v15 = vld [vmem:[#allocation2 + $0x364] ss:$16 sps:$4 sm:$0xff]   ;;  %v4804_v16 = vld [vmem:[#allocation2 + $0x360] ss:$16 sps:$4 sm:$0xff]  }
 0x49d   :  { %2844 = vmatprep.subr.bf16.mxu0 %v4904_v22  ;;  %v4805_v17 = vld [vmem:[#allocation2 + $0x384] ss:$16 sps:$4 sm:$0xff]  }
 0x4a0   :  { %2845 = vmatpush1.bf16.msra.mxu0 %v2525_v13  ;;  %v4801_v13 = vld [vmem:[#allocation2 + $0x344] ss:$16 sps:$4 sm:$0xff]  }
 0x4a1   :  { %2846 = vmatprep.subr.bf16.mxu0 %v4904_v22 }
 0x4a3   :  { %2638 = vmatmul.mubr.bf16.gmra.mrb[124].mxu0 %v4766_v18  ;;  %v4806_v18 = vld [vmem:[#allocation2 + $0x380] ss:$16 sps:$4 sm:$0xff]  }
 0x4a4   :  { %2645 = vmatprep.mubr.bf16.mxu0 %v4767_v19  ;;  %v4807_v19 = vld [vmem:[#allocation2 + $0x3a4] ss:$16 sps:$4 sm:$0xff]  }
 0x4a6   :  { %v4047_v20 = vpop.f32.mrb[76].mxu0 }
 0x4a7   :  { %v2439_v21 = vpop.f32.mrb[77].mxu0 }
 0x4a8   :  { %v4048_v23 = vpop.f32.mrb[78].mxu0 }
 0x4a9   :  { %v2527_v24 = vpack.c.bf16 %v4048_v23, %v4047_v20  ;;  %v2442_v25 = vpop.f32.mrb[79].mxu0  ;;  %v4808_v20 = vld [vmem:[#allocation2 + $0x3a0] ss:$16 sps:$4 sm:$0xff]  }
 0x4aa   :  { %v2526_v26 = vpack.c.bf16 %v2442_v25, %v2439_v21  ;;  %v4809_v21 = vld [vmem:[#allocation2 + $0x3c4] ss:$16 sps:$4 sm:$0xff]   ;;  %v4810_v23 = vld [vmem:[#allocation2 + $0x3c0] ss:$16 sps:$4 sm:$0xff]  }
 0x4ab   :  { %2646 = vmatmul.mubr.bf16.gmra.mrb[128].mxu0 %v4768_v27  ;;  %v4812_v25 = vld [vmem:[#allocation2 + $0x3e0] ss:$16 sps:$4 sm:$0xff]   ;;  %v4814_v27 = vld [vmem:[#allocation2 + $0x8] ss:$16 sps:$4 sm:$0xff]  }
 0x4ac   :  { %2847 = vmatpush1.bf16.msra.mxu0 %v2526_v26  ;;  %2653 = vmatprep.mubr.bf16.mxu0 %v4769_v28  ;;  %v4813_v26 = vld [vmem:[#allocation2 + $0xc] ss:$16 sps:$4 sm:$0xff]  }
 0x4ad   :  { %2848 = vmatprep.subr.bf16.mxu0 %v4904_v22  ;;  %v4815_v28 = vld [vmem:[#allocation2 + $0x2c] ss:$16 sps:$4 sm:$0xff]  }
 0x4b0   :  { %2849 = vmatpush1.bf16.msra.mxu0 %v2527_v24  ;;  %v4811_v24 = vld [vmem:[#allocation2 + $0x3e4] ss:$16 sps:$4 sm:$0xff]  }
 0x4b1   :  { %2850 = vmatprep.subr.bf16.mxu0 %v4904_v22 }
 0x4b3   :  { %2654 = vmatmul.mubr.bf16.gmra.mrb[132].mxu0 %v4770_v29  ;;  %v4816_v29 = vld [vmem:[#allocation2 + $0x28] ss:$16 sps:$4 sm:$0xff]  }
 0x4b4   :  { %2661 = vmatprep.mubr.bf16.mxu0 %v4771_v30  ;;  %v4817_v30 = vld [vmem:[#allocation2 + $0x4c] ss:$16 sps:$4 sm:$0xff]  }
 0x4b6   :  { %v4051_v31 = vpop.f32.mrb[80].mxu0 }
 0x4b7   :  { %v2455_v32 = vpop.f32.mrb[81].mxu0 }
 0x4b8   :  { %v4052_v33 = vpop.f32.mrb[82].mxu0 }
 0x4b9   :  { %v2529_v34 = vpack.c.bf16 %v4052_v33, %v4051_v31  ;;  %v2458_v35 = vpop.f32.mrb[83].mxu0  ;;  %v4818_v31 = vld [vmem:[#allocation2 + $0x48] ss:$16 sps:$4 sm:$0xff]  }
 0x4ba   :  { %v2528_v36 = vpack.c.bf16 %v2458_v35, %v2455_v32  ;;  %v4819_v32 = vld [vmem:[#allocation2 + $0x6c] ss:$16 sps:$4 sm:$0xff]   ;;  %v4820_v33 = vld [vmem:[#allocation2 + $0x68] ss:$16 sps:$4 sm:$0xff]  }
 0x4bb   :  { %2662 = vmatmul.mubr.bf16.gmra.mrb[136].mxu0 %v4772_v37  ;;  %v4822_v35 = vld [vmem:[#allocation2 + $0x88] ss:$16 sps:$4 sm:$0xff]  }
 0x4bc   :  { %2851 = vmatpush1.bf16.msra.mxu0 %v2528_v36  ;;  %2669 = vmatprep.mubr.bf16.mxu0 %v4773_v38  ;;  %v4823_v36 = vld [vmem:[#allocation2 + $0xac] ss:$16 sps:$4 sm:$0xff]   ;;  %v4824_v37 = vld [vmem:[#allocation2 + $0xa8] ss:$16 sps:$4 sm:$0xff]  }
 0x4bd   :  { %2852 = vmatprep.subr.bf16.mxu0 %v4904_v22  ;;  %v4825_v38 = vld [vmem:[#allocation2 + $0xcc] ss:$16 sps:$4 sm:$0xff]  }
 0x4c0   :  { %2853 = vmatpush1.bf16.msra.mxu0 %v2529_v34  ;;  %v4821_v34 = vld [vmem:[#allocation2 + $0x8c] ss:$16 sps:$4 sm:$0xff]  }
 0x4c1   :  { %2854 = vmatprep.subr.bf16.mxu0 %v4904_v22 }
 0x4c3   :  { %2670 = vmatmul.mubr.bf16.gmra.mrb[140].mxu0 %v4774_v39  ;;  %v4826_v39 = vld [vmem:[#allocation2 + $0xc8] ss:$16 sps:$4 sm:$0xff]  }
 0x4c4   :  { %2677 = vmatprep.mubr.bf16.mxu0 %v4775_v40  ;;  %v4827_v40 = vld [vmem:[#allocation2 + $0xec] ss:$16 sps:$4 sm:$0xff]  }
 0x4c6   :  { %v4055_v41 = vpop.f32.mrb[84].mxu0 }
 0x4c7   :  { %v2471_v42 = vpop.f32.mrb[85].mxu0 }
 0x4c8   :  { %v4056_v43 = vpop.f32.mrb[86].mxu0 }
 0x4c9   :  { %v2531_v44 = vpack.c.bf16 %v4056_v43, %v4055_v41  ;;  %v2474_v45 = vpop.f32.mrb[87].mxu0  ;;  %v4828_v41 = vld [vmem:[#allocation2 + $0xe8] ss:$16 sps:$4 sm:$0xff]  }
 0x4ca   :  { %v2530_v46 = vpack.c.bf16 %v2474_v45, %v2471_v42  ;;  %v4829_v42 = vld [vmem:[#allocation2 + $0x10c] ss:$16 sps:$4 sm:$0xff]   ;;  %v4830_v43 = vld [vmem:[#allocation2 + $0x108] ss:$16 sps:$4 sm:$0xff]  }
 0x4cb   :  { %2678 = vmatmul.mubr.bf16.gmra.mrb[144].mxu0 %v4776_v47  ;;  %v4832_v45 = vld [vmem:[#allocation2 + $0x128] ss:$16 sps:$4 sm:$0xff]  }
 0x4cc   :  { %2855 = vmatpush1.bf16.msra.mxu0 %v2530_v46  ;;  %2685 = vmatprep.mubr.bf16.mxu0 %v4777_v48  ;;  %v4833_v46 = vld [vmem:[#allocation2 + $0x14c] ss:$16 sps:$4 sm:$0xff]   ;;  %v4834_v47 = vld [vmem:[#allocation2 + $0x148] ss:$16 sps:$4 sm:$0xff]  }
 0x4cd   :  { %2856 = vmatprep.subr.bf16.mxu0 %v4904_v22  ;;  %v4835_v48 = vld [vmem:[#allocation2 + $0x16c] ss:$16 sps:$4 sm:$0xff]  }
 0x4d0   :  { %2857 = vmatpush1.bf16.msra.mxu0 %v2531_v44  ;;  %v4831_v44 = vld [vmem:[#allocation2 + $0x12c] ss:$16 sps:$4 sm:$0xff]  }
 0x4d1   :  { %2858 = vmatprep.subr.bf16.mxu0 %v4904_v22 }
 0x4d3   :  { %2686 = vmatmul.mubr.bf16.gmra.mrb[148].mxu0 %v4778_v49  ;;  %v4836_v49 = vld [vmem:[#allocation2 + $0x168] ss:$16 sps:$4 sm:$0xff]  }
 0x4d4   :  { %2693 = vmatprep.mubr.bf16.mxu0 %v4779_v50  ;;  %v4837_v50 = vld [vmem:[#allocation2 + $0x18c] ss:$16 sps:$4 sm:$0xff]  }
 0x4d6   :  { %v4059_v51 = vpop.f32.mrb[88].mxu0 }
 0x4d7   :  { %v2487_v52 = vpop.f32.mrb[89].mxu0 }
 0x4d8   :  { %v4060_v53 = vpop.f32.mrb[90].mxu0 }
 0x4d9   :  { %v2533_v54 = vpack.c.bf16 %v4060_v53, %v4059_v51  ;;  %v2490_v55 = vpop.f32.mrb[91].mxu0  ;;  %v4838_v51 = vld [vmem:[#allocation2 + $0x188] ss:$16 sps:$4 sm:$0xff]  }
 0x4da   :  { %v2532_v56 = vpack.c.bf16 %v2490_v55, %v2487_v52  ;;  %v4839_v52 = vld [vmem:[#allocation2 + $0x1ac] ss:$16 sps:$4 sm:$0xff]   ;;  %v4840_v53 = vld [vmem:[#allocation2 + $0x1a8] ss:$16 sps:$4 sm:$0xff]  }
 0x4db   :  { %2694 = vmatmul.mubr.bf16.gmra.mrb[152].mxu0 %v4780_v57  ;;  %v4842_v55 = vld [vmem:[#allocation2 + $0x1c8] ss:$16 sps:$4 sm:$0xff]  }
 0x4dc   :  { %2859 = vmatpush1.bf16.msra.mxu0 %v2532_v56  ;;  %2701 = vmatprep.mubr.bf16.mxu0 %v4781_v58  ;;  %v4843_v56 = vld [vmem:[#allocation2 + $0x1ec] ss:$16 sps:$4 sm:$0xff]   ;;  %v4844_v57 = vld [vmem:[#allocation2 + $0x1e8] ss:$16 sps:$4 sm:$0xff]  }
 0x4dd   :  { %2860 = vmatprep.subr.bf16.mxu0 %v4904_v22  ;;  %v4791_v22 = vld [vmem:[#allocation2 + $0x2a4] ss:$16 sps:$4 sm:$0xff]   ;;  %v4845_v58 = vld [vmem:[#allocation2 + $0x20c] ss:$16 sps:$4 sm:$0xff]  }
 0x4e0   :  { %2861 = vmatpush1.bf16.msra.mxu0 %v2533_v54  ;;  %v4841_v54 = vld [vmem:[#allocation2 + $0x1cc] ss:$16 sps:$4 sm:$0xff]  }
 0x4e3   :  { %2702 = vmatmul.mubr.bf16.gmra.mrb[156].mxu0 %v4782_v59  ;;  %v4846_v59 = vld [vmem:[#allocation2 + $0x208] ss:$16 sps:$4 sm:$0xff]  }
 0x4e4   :  { %2709 = vmatprep.mubr.bf16.mxu0 %v4783_v60  ;;  %v4847_v60 = vld [vmem:[#allocation2 + $0x22c] ss:$16 sps:$4 sm:$0xff]  }
 0x4eb   :  { %2710 = vmatmul.mubr.bf16.gmra.mrb[160].mxu0 %v4784_v61  ;;  %v4848_v61 = vld [vmem:[#allocation2 + $0x228] ss:$16 sps:$4 sm:$0xff]  }
 0x4ec   :  { %2717 = vmatprep.mubr.bf16.mxu0 %v4785_v62  ;;  %v4849_v62 = vld [vmem:[#allocation2 + $0x24c] ss:$16 sps:$4 sm:$0xff]  }
 0x4f3   :  { %2718 = vmatmul.mubr.bf16.gmra.mrb[164].mxu0 %v4786_v63  ;;  %v4850_v63 = vld [vmem:[#allocation2 + $0x248] ss:$16 sps:$4 sm:$0xff]  }
 0x4f4   :  { %2725 = vmatprep.mubr.bf16.mxu0 %v4787_v0  ;;  %v4851_v0 = vld [vmem:[#allocation2 + $0x26c] ss:$16 sps:$4 sm:$0xff]  }
 0x4fb   :  { %2726 = vmatmul.mubr.bf16.gmra.mrb[168].mxu0 %v4788_v1  ;;  %v4852_v1 = vld [vmem:[#allocation2 + $0x268] ss:$16 sps:$4 sm:$0xff]  }
 0x4fc   :  { %2733 = vmatprep.mubr.bf16.mxu0 %v4789_v2  ;;  %v4853_v2 = vld [vmem:[#allocation2 + $0x28c] ss:$16 sps:$4 sm:$0xff]  }
 0x503   :  { %2734 = vmatmul.mubr.bf16.gmra.mrb[172].mxu0 %v4790_v3  ;;  %v4854_v3 = vld [vmem:[#allocation2 + $0x288] ss:$16 sps:$4 sm:$0xff]  }
 0x504   :  { %2741 = vmatprep.mubr.bf16.mxu0 %v4791_v22  ;;  %v4855_v22 = vld [vmem:[#allocation2 + $0x2ac] ss:$16 sps:$4 sm:$0xff]  }
 0x50b   :  { %2742 = vmatmul.mubr.bf16.gmra.mrb[176].mxu0 %v4792_v4  ;;  %v4856_v4 = vld [vmem:[#allocation2 + $0x2a8] ss:$16 sps:$4 sm:$0xff]  }
 0x50c   :  { %2749 = vmatprep.mubr.bf16.mxu0 %v4793_v6  ;;  %v4857_v6 = vld [vmem:[#allocation2 + $0x2cc] ss:$16 sps:$4 sm:$0xff]  }
 0x513   :  { %2750 = vmatmul.mubr.bf16.gmra.mrb[180].mxu0 %v4794_v7  ;;  %v4858_v7 = vld [vmem:[#allocation2 + $0x2c8] ss:$16 sps:$4 sm:$0xff]  }
 0x514   :  { %2757 = vmatprep.mubr.bf16.mxu0 %v4795_v8  ;;  %v4859_v8 = vld [vmem:[#allocation2 + $0x2ec] ss:$16 sps:$4 sm:$0xff]  }
 0x51b   :  { %2758 = vmatmul.mubr.bf16.gmra.mrb[184].mxu0 %v4796_v9  ;;  %v4860_v9 = vld [vmem:[#allocation2 + $0x2e8] ss:$16 sps:$4 sm:$0xff]  }
 0x51c   :  { %2765 = vmatprep.mubr.bf16.mxu0 %v4797_v10  ;;  %v4861_v10 = vld [vmem:[#allocation2 + $0x30c] ss:$16 sps:$4 sm:$0xff]  }
 0x523   :  { %2766 = vmatmul.mubr.bf16.gmra.mrb[188].mxu0 %v4798_v11  ;;  %v4862_v11 = vld [vmem:[#allocation2 + $0x308] ss:$16 sps:$4 sm:$0xff]  }
 0x524   :  { %2773 = vmatprep.mubr.bf16.mxu0 %v4799_v5  ;;  %v4863_v5 = vld [vmem:[#allocation2 + $0x32c] ss:$16 sps:$4 sm:$0xff]  }
 0x52b   :  { %2774 = vmatmul.mubr.bf16.gmra.mrb[192].mxu0 %v4800_v12  ;;  %v4864_v12 = vld [vmem:[#allocation2 + $0x328] ss:$16 sps:$4 sm:$0xff]  }
 0x52c   :  { %2781 = vmatprep.mubr.bf16.mxu0 %v4801_v13  ;;  %v4865_v13 = vld [vmem:[#allocation2 + $0x34c] ss:$16 sps:$4 sm:$0xff]  }
 0x533   :  { %2782 = vmatmul.mubr.bf16.gmra.mrb[196].mxu0 %v4802_v14  ;;  %v4866_v14 = vld [vmem:[#allocation2 + $0x348] ss:$16 sps:$4 sm:$0xff]  }
 0x534   :  { %2789 = vmatprep.mubr.bf16.mxu0 %v4803_v15  ;;  %v5285_v15 = vld [vmem:[%s5494_s5] ss:$0 sm:$0xff] }
 0x53b   :  { %2790 = vmatmul.mubr.bf16.gmra.mrb[200].mxu0 %v4804_v16  ;;  %v4867_v16 = vld [vmem:[#allocation2 + $0x36c] ss:$16 sps:$4 sm:$0xff]  }
 0x53c   :  { %2797 = vmatprep.mubr.bf16.mxu0 %v4805_v17 }
 0x543   :  { %2798 = vmatmul.mubr.bf16.gmra.mrb[204].mxu0 %v4806_v18 }
 0x544   :  { %2805 = vmatprep.mubr.bf16.mxu0 %v4807_v19 }
 0x54b   :  { %2806 = vmatmul.mubr.bf16.gmra.mrb[208].mxu0 %v4808_v20 }
 0x54c   :  { %2813 = vmatprep.mubr.bf16.mxu0 %v4809_v21 }
 0x553   :  { %2814 = vmatmul.mubr.bf16.gmra.mrb[212].mxu0 %v4810_v23 }
 0x554   :  { %2821 = vmatprep.mubr.bf16.mxu0 %v4811_v24 }
 0x55b   :  { %2822 = vmatmul.mubr.bf16.gmra.mrb[216].mxu0 %v4812_v25 }
 0x55c   :  { %2862 = vmatprep.mubr.bf16.mxu0 %v4813_v26  ;;  %v4868_v26 = vld [vmem:[#allocation2 + $0x368] ss:$16 sps:$4 sm:$0xff]  }
 0x563   :  { %2863 = vmatmul.mubr.bf16.vlgmr.msra.gmra.mrb[92].mxu0 %v4814_v27  ;;  %v4869_v27 = vld [vmem:[#allocation2 + $0x38c] ss:$16 sps:$4 sm:$0xff]  }
 0x564   :  { %2870 = vmatprep.mubr.bf16.mxu0 %v4815_v28 }
 0x56b   :  { %2871 = vmatmul.mubr.bf16.gmra.mrb[96].mxu0 %v4816_v29 }
 0x56c   :  { %2878 = vmatprep.mubr.bf16.mxu0 %v4817_v30 }
 0x573   :  { %2879 = vmatmul.mubr.bf16.gmra.mrb[100].mxu0 %v4818_v31 }
 0x574   :  { %2886 = vmatprep.mubr.bf16.mxu0 %v4819_v32 }
 0x57b   :  { %2887 = vmatmul.mubr.bf16.gmra.mrb[104].mxu0 %v4820_v33 }
 0x57c   :  { %2894 = vmatprep.mubr.bf16.mxu0 %v4821_v34 }
 0x583   :  { %2895 = vmatmul.mubr.bf16.gmra.mrb[108].mxu0 %v4822_v35 }
 0x584   :  { %2902 = vmatprep.mubr.bf16.mxu0 %v4823_v36 }
 0x58b   :  { %2903 = vmatmul.mubr.bf16.gmra.mrb[112].mxu0 %v4824_v37  ;;  %v4870_v37 = vld [vmem:[#allocation2 + $0x388] ss:$16 sps:$4 sm:$0xff]  }
 0x58c   :  { %2910 = vmatprep.mubr.bf16.mxu0 %v4825_v38  ;;  %v4871_v38 = vld [vmem:[#allocation2 + $0x3ac] ss:$16 sps:$4 sm:$0xff]  }
 0x593   :  { %2911 = vmatmul.mubr.bf16.gmra.mrb[116].mxu0 %v4826_v39 }
 0x594   :  { %2918 = vmatprep.mubr.bf16.mxu0 %v4827_v40 }
 0x59b   :  { %2919 = vmatmul.mubr.bf16.gmra.mrb[120].mxu0 %v4828_v41 }
 0x59c   :  { %2926 = vmatprep.mubr.bf16.mxu0 %v4829_v42 }
 0x5a3   :  { %2927 = vmatmul.mubr.bf16.gmra.mrb[124].mxu0 %v4830_v43 }
 0x5a4   :  { %2934 = vmatprep.mubr.bf16.mxu0 %v4831_v44 }
 0x5ab   :  { %2935 = vmatmul.mubr.bf16.gmra.mrb[128].mxu0 %v4832_v45 }
 0x5ac   :  { %2942 = vmatprep.mubr.bf16.mxu0 %v4833_v46 }
 0x5b3   :  { %2943 = vmatmul.mubr.bf16.gmra.mrb[132].mxu0 %v4834_v47 }
 0x5b4   :  { %2950 = vmatprep.mubr.bf16.mxu0 %v4835_v48  ;;  %v4872_v48 = vld [vmem:[#allocation2 + $0x3a8] ss:$16 sps:$4 sm:$0xff]  }
 0x5bb   :  { %2951 = vmatmul.mubr.bf16.gmra.mrb[136].mxu0 %v4836_v49  ;;  %v4873_v49 = vld [vmem:[#allocation2 + $0x3cc] ss:$16 sps:$4 sm:$0xff]  }
 0x5bc   :  { %2958 = vmatprep.mubr.bf16.mxu0 %v4837_v50 }
 0x5c3   :  { %2959 = vmatmul.mubr.bf16.gmra.mrb[140].mxu0 %v4838_v51 }
 0x5c4   :  { %2966 = vmatprep.mubr.bf16.mxu0 %v4839_v52 }
 0x5cb   :  { %2967 = vmatmul.mubr.bf16.gmra.mrb[144].mxu0 %v4840_v53 }
 0x5cc   :  { %2974 = vmatprep.mubr.bf16.mxu0 %v4841_v54 }
 0x5d3   :  { %2975 = vmatmul.mubr.bf16.gmra.mrb[148].mxu0 %v4842_v55 }
 0x5d4   :  { %2982 = vmatprep.mubr.bf16.mxu0 %v4843_v56 }
 0x5db   :  { %2983 = vmatmul.mubr.bf16.gmra.mrb[152].mxu0 %v4844_v57 }
 0x5dc   :  { %2990 = vmatprep.mubr.bf16.mxu0 %v4845_v58 }
 0x5e3   :  { %2991 = vmatmul.mubr.bf16.gmra.mrb[156].mxu0 %v4846_v59  ;;  %v4874_v59 = vld [vmem:[#allocation2 + $0x3c8] ss:$16 sps:$4 sm:$0xff]  }
 0x5e4   :  { %2998 = vmatprep.mubr.bf16.mxu0 %v4847_v60  ;;  %v4875_v60 = vld [vmem:[#allocation2 + $0x3ec] ss:$16 sps:$4 sm:$0xff]  }
 0x5eb   :  { %2999 = vmatmul.mubr.bf16.gmra.mrb[160].mxu0 %v4848_v61 }
 0x5ec   :  { %3006 = vmatprep.mubr.bf16.mxu0 %v4849_v62 }
 0x5f3   :  { %3007 = vmatmul.mubr.bf16.gmra.mrb[164].mxu0 %v4850_v63 }
 0x5f4   :  { %3014 = vmatprep.mubr.bf16.mxu0 %v4851_v0 }
 0x5fb   :  { %3015 = vmatmul.mubr.bf16.gmra.mrb[168].mxu0 %v4852_v1 }
 0x5fc   :  { %3022 = vmatprep.mubr.bf16.mxu0 %v4853_v2 }
 0x603   :  { %3023 = vmatmul.mubr.bf16.gmra.mrb[172].mxu0 %v4854_v3 }
 0x604   :  { %3030 = vmatprep.mubr.bf16.mxu0 %v4855_v22 }
 0x60b   :  { %3031 = vmatmul.mubr.bf16.gmra.mrb[176].mxu0 %v4856_v4 }
 0x60c   :  { %3038 = vmatprep.mubr.bf16.mxu0 %v4857_v6  ;;  %v4876_v6 = vld [vmem:[#allocation2 + $0x3e8] ss:$16 sps:$4 sm:$0xff]  }
 0x613   :  { %3039 = vmatmul.mubr.bf16.gmra.mrb[180].mxu0 %v4858_v7 }
 0x614   :  { %3046 = vmatprep.mubr.bf16.mxu0 %v4859_v8 }
 0x61b   :  { %3047 = vmatmul.mubr.bf16.gmra.mrb[184].mxu0 %v4860_v9 }
 0x61c   :  { %3054 = vmatprep.mubr.bf16.mxu0 %v4861_v10 }
 0x623   :  { %3055 = vmatmul.mubr.bf16.gmra.mrb[188].mxu0 %v4862_v11 }
 0x624   :  { %3062 = vmatprep.mubr.bf16.mxu0 %v4863_v5 }
 0x62b   :  { %3063 = vmatmul.mubr.bf16.gmra.mrb[192].mxu0 %v4864_v12 }
 0x62c   :  { %3070 = vmatprep.mubr.bf16.mxu0 %v4865_v13 }
 0x633   :  { %3071 = vmatmul.mubr.bf16.gmra.mrb[196].mxu0 %v4866_v14 }
 0x634   :  { %3078 = vmatprep.mubr.bf16.mxu0 %v4867_v16 }
 0x636   :  { %v2864_v17 = vpop.f32.mrb[92].mxu0 }
 0x637   :  { %v4167_v18 = vadd.f32 %v5285_v15, %v2864_v17  ;;  %v2866_v19 = vpop.f32.mrb[93].mxu0 }
 0x638   :  { %v2867_v20 = vpop.f32.mrb[94].mxu0 }
 0x639   :  { %v4168_v21 = vadd.f32 %v5285_v15, %v2867_v20  ;;  %v2869_v23 = vpop.f32.mrb[95].mxu0  ;;  %v3119_v24 = vmax.f32 %v4167_v18, 0.0 }
 0x63b   :  { %v3120_v25 = vmax.f32 %v4168_v21, 0.0  ;;  %3079 = vmatmul.mubr.bf16.gmra.mrb[200].mxu0 %v4868_v26 }
 0x63c   :  { %3086 = vmatprep.mubr.bf16.mxu0 %v4869_v27 }
 0x63d   :  { %v5289_v28 = vpack.c.bf16 %v3120_v25, %v3119_v24 }
 0x63e   :  { %v2872_v29 = vpop.f32.mrb[96].mxu0 }
 0x63f   :  { %v4169_v30 = vadd.f32 %v5285_v15, %v2872_v29  ;;  %v2874_v31 = vpop.f32.mrb[97].mxu0 }
 0x640   :  { %v2875_v32 = vpop.f32.mrb[98].mxu0 }
 0x641   :  { %v4170_v33 = vadd.f32 %v5285_v15, %v2875_v32  ;;  %v2877_v34 = vpop.f32.mrb[99].mxu0  ;;  %v3121_v35 = vmax.f32 %v4169_v30, 0.0 }
 0x643   :  { %v3122_v36 = vmax.f32 %v4170_v33, 0.0  ;;  %3087 = vmatmul.mubr.bf16.gmra.mrb[204].mxu0 %v4870_v37 }
 0x644   :  { %3094 = vmatprep.mubr.bf16.mxu0 %v4871_v38 }
 0x645   :  { %v5293_v39 = vpack.c.bf16 %v3122_v36, %v3121_v35 }
 0x646   :  { %v2880_v40 = vpop.f32.mrb[100].mxu0 }
 0x647   :  { %v4171_v41 = vadd.f32 %v5285_v15, %v2880_v40  ;;  %v2882_v42 = vpop.f32.mrb[101].mxu0 }
 0x648   :  { %v2883_v43 = vpop.f32.mrb[102].mxu0 }
 0x649   :  { %v4172_v44 = vadd.f32 %v5285_v15, %v2883_v43  ;;  %v2885_v45 = vpop.f32.mrb[103].mxu0  ;;  %v3123_v46 = vmax.f32 %v4171_v41, 0.0 }
 0x64b   :  { %v3124_v47 = vmax.f32 %v4172_v44, 0.0  ;;  %3095 = vmatmul.mubr.bf16.gmra.mrb[208].mxu0 %v4872_v48 }
 0x64c   :  { %3102 = vmatprep.mubr.bf16.mxu0 %v4873_v49 }
 0x64d   :  { %v5297_v50 = vpack.c.bf16 %v3124_v47, %v3123_v46  ;;  %v4729_v47 = vld [vmem:[%s5495_s6 + $0x4] ss:$16 sps:$4 sm:$0xff]  }
 0x64e   :  { %v2888_v51 = vpop.f32.mrb[104].mxu0  ;;  %3271 = vmatprep.mubr.bf16.mxu1 %v4729_v47 }
 0x64f   :  { %v4173_v52 = vadd.f32 %v5285_v15, %v2888_v51  ;;  %v2890_v53 = vpop.f32.mrb[105].mxu0 }
 0x650   :  { %v2891_v54 = vpop.f32.mrb[106].mxu0 }
 0x651   :  { %v4174_v55 = vadd.f32 %v5285_v15, %v2891_v54  ;;  %v2893_v56 = vpop.f32.mrb[107].mxu0  ;;  %v3125_v57 = vmax.f32 %v4173_v52, 0.0 }
 0x653   :  { %v3126_v58 = vmax.f32 %v4174_v55, 0.0  ;;  %3103 = vmatmul.mubr.bf16.gmra.mrb[212].mxu0 %v4874_v59 }
 0x654   :  { %3110 = vmatprep.mubr.bf16.mxu0 %v4875_v60 }
 0x655   :  { %v5301_v61 = vpack.c.bf16 %v3126_v58, %v3125_v57 }
 0x656   :  { %v2896_v62 = vpop.f32.mrb[108].mxu0 }
 0x657   :  { %v4175_v63 = vadd.f32 %v5285_v15, %v2896_v62  ;;  %v2898_v0 = vpop.f32.mrb[109].mxu0 }
 0x658   :  { %v2899_v1 = vpop.f32.mrb[110].mxu0 }
 0x659   :  { %v4176_v2 = vadd.f32 %v5285_v15, %v2899_v1  ;;  %v2901_v3 = vpop.f32.mrb[111].mxu0  ;;  %v3127_v22 = vmax.f32 %v4175_v63, 0.0 }
 0x65b   :  { %v3128_v4 = vmax.f32 %v4176_v2, 0.0  ;;  %3111 = vmatmul.mubr.bf16.gmra.mrb[216].mxu0 %v4876_v6 }
 0x65d   :  { %v5305_v7 = vpack.c.bf16 %v3128_v4, %v3127_v22 }
 0x65e   :  { %v2904_v8 = vpop.f32.mrb[112].mxu0 }
 0x65f   :  { %v4177_v9 = vadd.f32 %v5285_v15, %v2904_v8  ;;  %v2906_v10 = vpop.f32.mrb[113].mxu0 }
 0x660   :  { %v2907_v11 = vpop.f32.mrb[114].mxu0 }
 0x661   :  { %v4178_v5 = vadd.f32 %v5285_v15, %v2907_v11  ;;  %v2909_v12 = vpop.f32.mrb[115].mxu0  ;;  %v3129_v13 = vmax.f32 %v4177_v9, 0.0 }
 0x663   :  { %v3130_v14 = vmax.f32 %v4178_v5, 0.0 }
 0x665   :  { %v5309_v16 = vpack.c.bf16 %v3130_v14, %v3129_v13 }
 0x666   :  { %v2912_v17 = vpop.f32.mrb[116].mxu0 }
 0x667   :  { %v4179_v18 = vadd.f32 %v5285_v15, %v2912_v17  ;;  %v2914_v19 = vpop.f32.mrb[117].mxu0 }
 0x668   :  { %v2915_v20 = vpop.f32.mrb[118].mxu0 }
 0x669   :  { %v4180_v21 = vadd.f32 %v5285_v15, %v2915_v20  ;;  %v2917_v23 = vpop.f32.mrb[119].mxu0  ;;  %v3131_v24 = vmax.f32 %v4179_v18, 0.0 }
 0x66b   :  { %v3132_v25 = vmax.f32 %v4180_v21, 0.0 }
 0x66d   :  { %v5313_v26 = vpack.c.bf16 %v3132_v25, %v3131_v24 }
 0x66e   :  { %v2920_v27 = vpop.f32.mrb[120].mxu0 }
 0x66f   :  { %v4181_v29 = vadd.f32 %v5285_v15, %v2920_v27  ;;  %v2922_v30 = vpop.f32.mrb[121].mxu0 }
 0x670   :  { %v2923_v31 = vpop.f32.mrb[122].mxu0 }
 0x671   :  { %v4182_v32 = vadd.f32 %v5285_v15, %v2923_v31  ;;  %v2925_v33 = vpop.f32.mrb[123].mxu0  ;;  %v3133_v34 = vmax.f32 %v4181_v29, 0.0 }
 0x673   :  { %v3134_v35 = vmax.f32 %v4182_v32, 0.0 }
 0x675   :  { %v5317_v36 = vpack.c.bf16 %v3134_v35, %v3133_v34 }
 0x676   :  { %v2928_v37 = vpop.f32.mrb[124].mxu0 }
 0x677   :  { %v4183_v38 = vadd.f32 %v5285_v15, %v2928_v37  ;;  %v2930_v40 = vpop.f32.mrb[125].mxu0 }
 0x678   :  { %v2931_v41 = vpop.f32.mrb[126].mxu0 }
 0x679   :  { %v4184_v42 = vadd.f32 %v5285_v15, %v2931_v41  ;;  %v2933_v43 = vpop.f32.mrb[127].mxu0  ;;  %v3135_v44 = vmax.f32 %v4183_v38, 0.0 }
 0x67b   :  { %v3136_v45 = vmax.f32 %v4184_v42, 0.0 }
 0x67d   :  { %v3195_v46 = vpack.c.bf16 %v3136_v45, %v3135_v44 }
 0x67e   :  { %v2936_v48 = vpop.f32.mrb[128].mxu0 }
 0x67f   :  { %v4185_v49 = vadd.f32 %v5285_v15, %v2936_v48  ;;  %v2938_v51 = vpop.f32.mrb[129].mxu0  ;;  %3853 = vmatprep.subr.bf16.mxu1 %v3195_v46 }
 0x680   :  { %v2939_v52 = vpop.f32.mrb[130].mxu0  ;;  %3854 = vmatpush3.bf16.msra.mxu1 %v5289_v28 }
 0x681   :  { %v4186_v53 = vadd.f32 %v5285_v15, %v2939_v52  ;;  %v2941_v54 = vpop.f32.mrb[131].mxu0  ;;  %v3137_v55 = vmax.f32 %v4185_v49, 0.0 }
 0x682   :  { %v4727_v54 = vld [vmem:[%s5495_s6] ss:$16 sps:$4 sm:$0xff]  }
 0x683   :  { %v3138_v56 = vmax.f32 %v4186_v53, 0.0 }
 0x685   :  { %v3196_v57 = vpack.c.bf16 %v3138_v56, %v3137_v55 }
 0x686   :  { %v2944_v58 = vpop.f32.mrb[132].mxu0 }
 0x687   :  { %v4187_v59 = vadd.f32 %v5285_v15, %v2944_v58  ;;  %v2946_v60 = vpop.f32.mrb[133].mxu0  ;;  %3855 = vmatprep.subr.bf16.mxu1 %v3196_v57 }
 0x688   :  { %v2947_v62 = vpop.f32.mrb[134].mxu0  ;;  %3856 = vmatpush3.bf16.msra.mxu1 %v5293_v39 }
 0x689   :  { %v4188_v63 = vadd.f32 %v5285_v15, %v2947_v62  ;;  %v2949_v0 = vpop.f32.mrb[135].mxu0  ;;  %v3139_v1 = vmax.f32 %v4187_v59, 0.0 }
 0x68b   :  { %v3140_v2 = vmax.f32 %v4188_v63, 0.0 }
 0x68d   :  { %v3197_v28 = vpack.c.bf16 %v3140_v2, %v3139_v1 }
 0x68e   :  { %v2952_v3 = vpop.f32.mrb[136].mxu0 }
 0x68f   :  { %v4189_v22 = vadd.f32 %v5285_v15, %v2952_v3  ;;  %v2954_v4 = vpop.f32.mrb[137].mxu0  ;;  %3857 = vmatprep.subr.bf16.mxu1 %v3197_v28 }
 0x690   :  { %v2955_v6 = vpop.f32.mrb[138].mxu0  ;;  %3858 = vmatpush3.bf16.msra.mxu1 %v5297_v50 }
 0x691   :  { %v4190_v8 = vadd.f32 %v5285_v15, %v2955_v6  ;;  %v2957_v9 = vpop.f32.mrb[139].mxu0  ;;  %v3141_v10 = vmax.f32 %v4189_v22, 0.0 }
 0x693   :  { %v3142_v11 = vmax.f32 %v4190_v8, 0.0 }
 0x695   :  { %v3198_v39 = vpack.c.bf16 %v3142_v11, %v3141_v10 }
 0x696   :  { %v2960_v5 = vpop.f32.mrb[140].mxu0 }
 0x697   :  { %v4191_v12 = vadd.f32 %v5285_v15, %v2960_v5  ;;  %v2962_v13 = vpop.f32.mrb[141].mxu0  ;;  %3859 = vmatprep.subr.bf16.mxu1 %v3198_v39 }
 0x698   :  { %v2963_v14 = vpop.f32.mrb[142].mxu0  ;;  %3860 = vmatpush3.bf16.msra.mxu1 %v5301_v61 }
 0x699   :  { %v4192_v17 = vadd.f32 %v5285_v15, %v2963_v14  ;;  %v2965_v18 = vpop.f32.mrb[143].mxu0  ;;  %v3143_v19 = vmax.f32 %v4191_v12, 0.0 }
 0x69b   :  { %v3144_v20 = vmax.f32 %v4192_v17, 0.0 }
 0x69d   :  { %v3199_v50 = vpack.c.bf16 %v3144_v20, %v3143_v19 }
 0x69e   :  { %v2968_v21 = vpop.f32.mrb[144].mxu0 }
 0x69f   :  { %v4193_v23 = vadd.f32 %v5285_v15, %v2968_v21  ;;  %v2970_v24 = vpop.f32.mrb[145].mxu0  ;;  %3861 = vmatprep.subr.bf16.mxu1 %v3199_v50 }
 0x6a0   :  { %v2971_v25 = vpop.f32.mrb[146].mxu0  ;;  %3862 = vmatpush3.bf16.msra.mxu1 %v5305_v7 }
 0x6a1   :  { %v4194_v27 = vadd.f32 %v5285_v15, %v2971_v25  ;;  %v2973_v29 = vpop.f32.mrb[147].mxu0  ;;  %v3145_v30 = vmax.f32 %v4193_v23, 0.0 }
 0x6a3   :  { %v3146_v31 = vmax.f32 %v4194_v27, 0.0 }
 0x6a5   :  { %v3200_v61 = vpack.c.bf16 %v3146_v31, %v3145_v30 }
 0x6a6   :  { %v2976_v32 = vpop.f32.mrb[148].mxu0 }
 0x6a7   :  { %v4195_v33 = vadd.f32 %v5285_v15, %v2976_v32  ;;  %v2978_v34 = vpop.f32.mrb[149].mxu0  ;;  %3863 = vmatprep.subr.bf16.mxu1 %v3200_v61 }
 0x6a8   :  { %v2979_v35 = vpop.f32.mrb[150].mxu0  ;;  %3864 = vmatpush3.bf16.msra.mxu1 %v5309_v16 }
 0x6a9   :  { %v4196_v37 = vadd.f32 %v5285_v15, %v2979_v35  ;;  %v2981_v38 = vpop.f32.mrb[151].mxu0  ;;  %v3147_v40 = vmax.f32 %v4195_v33, 0.0 }
 0x6ab   :  { %v3148_v41 = vmax.f32 %v4196_v37, 0.0 }
 0x6ad   :  { %v3201_v7 = vpack.c.bf16 %v3148_v41, %v3147_v40 }
 0x6ae   :  { %v2984_v42 = vpop.f32.mrb[152].mxu0 }
 0x6af   :  { %v4197_v43 = vadd.f32 %v5285_v15, %v2984_v42  ;;  %v2986_v44 = vpop.f32.mrb[153].mxu0  ;;  %3865 = vmatprep.subr.bf16.mxu1 %v3201_v7 }
 0x6b0   :  { %v2987_v45 = vpop.f32.mrb[154].mxu0  ;;  %3866 = vmatpush3.bf16.msra.mxu1 %v5313_v26  ;;  %v4732_v26 = vld [vmem:[%s5495_s6 + $0xc] ss:$16 sps:$4 sm:$0xff]  }
 0x6b1   :  { %v4198_v46 = vadd.f32 %v5285_v15, %v2987_v45  ;;  %v2989_v47 = vpop.f32.mrb[155].mxu0  ;;  %v3149_v48 = vmax.f32 %v4197_v43, 0.0 }
 0x6b3   :  { %v3150_v49 = vmax.f32 %v4198_v46, 0.0 }
 0x6b5   :  { %v3202_v16 = vpack.c.bf16 %v3150_v49, %v3149_v48 }
 0x6b6   :  { %v2992_v51 = vpop.f32.mrb[156].mxu0 }
 0x6b7   :  { %v4199_v52 = vadd.f32 %v5285_v15, %v2992_v51  ;;  %v2994_v53 = vpop.f32.mrb[157].mxu0  ;;  %3867 = vmatprep.subr.bf16.mxu1 %v3202_v16 }
 0x6b8   :  { %v2995_v55 = vpop.f32.mrb[158].mxu0  ;;  %3868 = vmatpush3.bf16.msra.mxu1 %v5317_v36 }
 0x6b9   :  { %v4200_v56 = vadd.f32 %v5285_v15, %v2995_v55  ;;  %v2997_v57 = vpop.f32.mrb[159].mxu0  ;;  %v3151_v58 = vmax.f32 %v4199_v52, 0.0 }
 0x6bb   :  { %v3152_v59 = vmax.f32 %v4200_v56, 0.0  ;;  %3272 = vmatmul.mubr.bf16.vlgmr.msra.gmra.mrb[164].mxu1 %v4727_v54 }
 0x6bc   :  { %3312 = vmatprep.mubr.bf16.mxu1 %v4732_v26 }
 0x6bd   :  { %v5354_v60 = vpack.c.bf16 %v3152_v59, %v3151_v58 }
 0x6be   :  { %v3000_v62 = vpop.f32.mrb[160].mxu0 }
 0x6bf   :  { %v4201_v63 = vadd.f32 %v5285_v15, %v3000_v62  ;;  %v3002_v0 = vpop.f32.mrb[161].mxu0 }
 0x6c0   :  { %v3003_v1 = vpop.f32.mrb[162].mxu0 }
 0x6c1   :  { %v4202_v36 = vadd.f32 %v5285_v15, %v3003_v1  ;;  %v3005_v2 = vpop.f32.mrb[163].mxu0  ;;  %v3153_v28 = vmax.f32 %v4201_v63, 0.0 }
 0x6c3   :  { %v3154_v3 = vmax.f32 %v4202_v36, 0.0 }
 0x6c5   :  { %v5358_v22 = vpack.c.bf16 %v3154_v3, %v3153_v28 }
 0x6c6   :  { %v3008_v4 = vpop.f32.mrb[164].mxu0 }
 0x6c7   :  { %v4203_v6 = vadd.f32 %v5285_v15, %v3008_v4  ;;  %v3010_v8 = vpop.f32.mrb[165].mxu0 }
 0x6c8   :  { %v3011_v9 = vpop.f32.mrb[166].mxu0 }
 0x6c9   :  { %v4204_v10 = vadd.f32 %v5285_v15, %v3011_v9  ;;  %v3013_v11 = vpop.f32.mrb[167].mxu0  ;;  %v3155_v39 = vmax.f32 %v4203_v6, 0.0 }
 0x6cb   :  { %v3156_v5 = vmax.f32 %v4204_v10, 0.0 }
 0x6cd   :  { %v5362_v12 = vpack.c.bf16 %v3156_v5, %v3155_v39 }
 0x6ce   :  { %v3016_v13 = vpop.f32.mrb[168].mxu0 }
 0x6cf   :  { %v4205_v14 = vadd.f32 %v5285_v15, %v3016_v13  ;;  %v3018_v17 = vpop.f32.mrb[169].mxu0 }
 0x6d0   :  { %v3019_v18 = vpop.f32.mrb[170].mxu0 }
 0x6d1   :  { %v4206_v19 = vadd.f32 %v5285_v15, %v3019_v18  ;;  %v3021_v20 = vpop.f32.mrb[171].mxu0  ;;  %v3157_v50 = vmax.f32 %v4205_v14, 0.0 }
 0x6d3   :  { %v3158_v21 = vmax.f32 %v4206_v19, 0.0 }
 0x6d5   :  { %v5366_v23 = vpack.c.bf16 %v3158_v21, %v3157_v50 }
 0x6d6   :  { %v3024_v24 = vpop.f32.mrb[172].mxu0 }
 0x6d7   :  { %v4207_v25 = vadd.f32 %v5285_v15, %v3024_v24  ;;  %v3026_v27 = vpop.f32.mrb[173].mxu0 }
 0x6d8   :  { %v3027_v29 = vpop.f32.mrb[174].mxu0 }
 0x6d9   :  { %v4208_v30 = vadd.f32 %v5285_v15, %v3027_v29  ;;  %v3029_v31 = vpop.f32.mrb[175].mxu0  ;;  %v3159_v61 = vmax.f32 %v4207_v25, 0.0 }
 0x6db   :  { %v3160_v32 = vmax.f32 %v4208_v30, 0.0 }
 0x6dd   :  { %v5370_v33 = vpack.c.bf16 %v3160_v32, %v3159_v61 }
 0x6de   :  { %v3032_v34 = vpop.f32.mrb[176].mxu0 }
 0x6df   :  { %v4209_v35 = vadd.f32 %v5285_v15, %v3032_v34  ;;  %v3034_v37 = vpop.f32.mrb[177].mxu0 }
 0x6e0   :  { %v3035_v38 = vpop.f32.mrb[178].mxu0 }
 0x6e1   :  { %v4210_v40 = vadd.f32 %v5285_v15, %v3035_v38  ;;  %v3037_v41 = vpop.f32.mrb[179].mxu0  ;;  %v3161_v7 = vmax.f32 %v4209_v35, 0.0 }
 0x6e3   :  { %v3162_v42 = vmax.f32 %v4210_v40, 0.0 }
 0x6e5   :  { %v5374_v43 = vpack.c.bf16 %v3162_v42, %v3161_v7 }
 0x6e6   :  { %v3040_v44 = vpop.f32.mrb[180].mxu0 }
 0x6e7   :  { %v4211_v45 = vadd.f32 %v5285_v15, %v3040_v44  ;;  %v3042_v46 = vpop.f32.mrb[181].mxu0 }
 0x6e8   :  { %v3043_v47 = vpop.f32.mrb[182].mxu0 }
 0x6e9   :  { %v4212_v48 = vadd.f32 %v5285_v15, %v3043_v47  ;;  %v3045_v49 = vpop.f32.mrb[183].mxu0  ;;  %v3163_v16 = vmax.f32 %v4211_v45, 0.0 }
 0x6eb   :  { %v3164_v51 = vmax.f32 %v4212_v48, 0.0 }
 0x6ed   :  { %v5378_v52 = vpack.c.bf16 %v3164_v51, %v3163_v16 }
 0x6ee   :  { %v3048_v53 = vpop.f32.mrb[184].mxu0 }
 0x6ef   :  { %v4213_v54 = vadd.f32 %v5285_v15, %v3048_v53  ;;  %v3050_v55 = vpop.f32.mrb[185].mxu0 }
 0x6f0   :  { %v3051_v26 = vpop.f32.mrb[186].mxu0 }
 0x6f1   :  { %v4214_v56 = vadd.f32 %v5285_v15, %v3051_v26  ;;  %v3053_v57 = vpop.f32.mrb[187].mxu0  ;;  %v3165_v58 = vmax.f32 %v4213_v54, 0.0 }
 0x6f3   :  { %v3166_v59 = vmax.f32 %v4214_v56, 0.0 }
 0x6f5   :  { %v5382_v62 = vpack.c.bf16 %v3166_v59, %v3165_v58 }
 0x6f6   :  { %v3056_v63 = vpop.f32.mrb[188].mxu0 }
 0x6f7   :  { %v4215_v0 = vadd.f32 %v5285_v15, %v3056_v63  ;;  %v3058_v1 = vpop.f32.mrb[189].mxu0 }
 0x6f8   :  { %v3059_v36 = vpop.f32.mrb[190].mxu0 }
 0x6f9   :  { %v4216_v2 = vadd.f32 %v5285_v15, %v3059_v36  ;;  %v3061_v28 = vpop.f32.mrb[191].mxu0  ;;  %v3167_v3 = vmax.f32 %v4215_v0, 0.0 }
 0x6fb   :  { %v3168_v4 = vmax.f32 %v4216_v2, 0.0 }
 0x6fd   :  { %v3211_v6 = vpack.c.bf16 %v3168_v4, %v3167_v3 }
 0x6fe   :  { %v3064_v8 = vpop.f32.mrb[192].mxu0 }
 0x6ff   :  { %v4217_v9 = vadd.f32 %v5285_v15, %v3064_v8  ;;  %v3066_v10 = vpop.f32.mrb[193].mxu0  ;;  %3875 = vmatprep.subr.bf16.mxu1 %v3211_v6 }
 0x700   :  { %v3067_v11 = vpop.f32.mrb[194].mxu0  ;;  %3876 = vmatpush3.bf16.msra.mxu1 %v5354_v60  ;;  %v4730_v10 = vld [vmem:[%s5495_s6 + $0x8] ss:$16 sps:$4 sm:$0xff]  }
 0x701   :  { %v4218_v39 = vadd.f32 %v5285_v15, %v3067_v11  ;;  %v3069_v5 = vpop.f32.mrb[195].mxu0  ;;  %v3169_v13 = vmax.f32 %v4217_v9, 0.0  ;;  %v4733_v11 = vld [vmem:[%s5496_s7] sm:$0xff]  }
 0x702   :  { %v4737_v5 = vld [vmem:[%s5496_s7 + $0x20] sm:$0xff]  }
 0x703   :  { %v3170_v14 = vmax.f32 %v4218_v39, 0.0  ;;  %v4905_v39 = vmov 0.0  }
 0x705   :  { %v3212_v17 = vpack.c.bf16 %v3170_v14, %v3169_v13  ;;  %v4738_v13 = vld [vmem:[%s5496_s7 + $0x28] sm:$0xff]  }
 0x706   :  { %v3072_v18 = vpop.f32.mrb[196].mxu0 }
 0x707   :  { %v4219_v19 = vadd.f32 %v5285_v15, %v3072_v18  ;;  %v3074_v20 = vpop.f32.mrb[197].mxu0  ;;  %3877 = vmatprep.subr.bf16.mxu1 %v3212_v17  ;;  %v4739_v18 = vld [vmem:[%s5496_s7 + $0x30] sm:$0xff]  }
 0x708   :  { %v3075_v50 = vpop.f32.mrb[198].mxu0  ;;  %3878 = vmatpush3.bf16.msra.mxu1 %v5358_v22 }
 0x709   :  { %v4220_v21 = vadd.f32 %v5285_v15, %v3075_v50  ;;  %v3077_v24 = vpop.f32.mrb[199].mxu0  ;;  %v3171_v25 = vmax.f32 %v4219_v19, 0.0 }
 0x70a   :  { %v4740_v24 = vld [vmem:[%s5496_s7 + $0x38] sm:$0xff]  }
 0x70b   :  { %v3172_v27 = vmax.f32 %v4220_v21, 0.0 }
 0x70d   :  { %v3213_v60 = vpack.c.bf16 %v3172_v27, %v3171_v25 }
 0x70e   :  { %v3080_v29 = vpop.f32.mrb[200].mxu0 }
 0x70f   :  { %v4221_v30 = vadd.f32 %v5285_v15, %v3080_v29  ;;  %v3082_v31 = vpop.f32.mrb[201].mxu0  ;;  %3879 = vmatprep.subr.bf16.mxu1 %v3213_v60 }
 0x710   :  { %v3083_v61 = vpop.f32.mrb[202].mxu0  ;;  %3880 = vmatpush3.bf16.msra.mxu1 %v5362_v12 }
 0x711   :  { %v4222_v32 = vadd.f32 %v5285_v15, %v3083_v61  ;;  %v3085_v34 = vpop.f32.mrb[203].mxu0  ;;  %v3173_v35 = vmax.f32 %v4221_v30, 0.0 }
 0x712   :  { %v4741_v34 = vld [vmem:[%s5498_s9] sm:$0xff]  }
 0x713   :  { %v3174_v37 = vmax.f32 %v4222_v32, 0.0 }
 0x715   :  { %v3214_v22 = vpack.c.bf16 %v3174_v37, %v3173_v35  ;;  %v4742_v37 = vld [vmem:[%s5498_s9 + $0x8] sm:$0xff]  }
 0x716   :  { %v3088_v38 = vpop.f32.mrb[204].mxu0 }
 0x717   :  { %v4223_v40 = vadd.f32 %v5285_v15, %v3088_v38  ;;  %v3090_v41 = vpop.f32.mrb[205].mxu0  ;;  %3881 = vmatprep.subr.bf16.mxu1 %v3214_v22  ;;  %v4743_v22 = vld [vmem:[%s5498_s9 + $0x10] sm:$0xff]   ;;  %v4744_v38 = vld [vmem:[%s5498_s9 + $0x18] sm:$0xff]  }
 0x718   :  { %v3091_v7 = vpop.f32.mrb[206].mxu0  ;;  %3882 = vmatpush3.bf16.msra.mxu1 %v5366_v23  ;;  %v4746_v41 = vld [vmem:[%s5498_s9 + $0x28] sm:$0xff]  }
 0x719   :  { %v4224_v42 = vadd.f32 %v5285_v15, %v3091_v7  ;;  %v3093_v44 = vpop.f32.mrb[207].mxu0  ;;  %v3175_v45 = vmax.f32 %v4223_v40, 0.0  ;;  %v4745_v40 = vld [vmem:[%s5498_s9 + $0x20] sm:$0xff]   ;;  %v4747_v7 = vld [vmem:[%s5498_s9 + $0x30] sm:$0xff]  }
 0x71a   :  { %v3762_v44 = vld [vmem:[%s5497_s8] ss:$0 sm:$0xff] }
 0x71b   :  { %v3176_v46 = vmax.f32 %v4224_v42, 0.0  ;;  %v4748_v42 = vld [vmem:[%s5498_s9 + $0x38] sm:$0xff]  }
 0x71d   :  { %v3215_v12 = vpack.c.bf16 %v3176_v46, %v3175_v45 }
 0x71e   :  { %v3096_v47 = vpop.f32.mrb[208].mxu0 }
 0x71f   :  { %v4225_v48 = vadd.f32 %v5285_v15, %v3096_v47  ;;  %v3098_v49 = vpop.f32.mrb[209].mxu0  ;;  %3883 = vmatprep.subr.bf16.mxu1 %v3215_v12 }
 0x720   :  { %v3099_v16 = vpop.f32.mrb[210].mxu0  ;;  %3884 = vmatpush3.bf16.msra.mxu1 %v5370_v33 }
 0x721   :  { %v4226_v51 = vadd.f32 %v5285_v15, %v3099_v16  ;;  %v3101_v53 = vpop.f32.mrb[211].mxu0  ;;  %v3177_v54 = vmax.f32 %v4225_v48, 0.0 }
 0x723   :  { %v3178_v55 = vmax.f32 %v4226_v51, 0.0 }
 0x725   :  { %v3216_v23 = vpack.c.bf16 %v3178_v55, %v3177_v54  ;;  %v3771_v54 = vld [vmem:[%s5499_s10] ss:$0 sm:$0xff] }
 0x726   :  { %v3104_v26 = vpop.f32.mrb[212].mxu0 }
 0x727   :  { %v4227_v56 = vadd.f32 %v5285_v15, %v3104_v26  ;;  %v3106_v57 = vpop.f32.mrb[213].mxu0  ;;  %3885 = vmatprep.subr.bf16.mxu1 %v3216_v23 }
 0x728   :  { %v3107_v58 = vpop.f32.mrb[214].mxu0  ;;  %3886 = vmatpush3.bf16.msra.mxu1 %v5374_v43 }
 0x729   :  { %v4228_v59 = vadd.f32 %v5285_v15, %v3107_v58  ;;  %v3109_v63 = vpop.f32.mrb[215].mxu0  ;;  %v3179_v0 = vmax.f32 %v4227_v56, 0.0 }
 0x72b   :  { %v3180_v1 = vmax.f32 %v4228_v59, 0.0 }
 0x72d   :  { %v3217_v33 = vpack.c.bf16 %v3180_v1, %v3179_v0 }
 0x72e   :  { %v3112_v36 = vpop.f32.mrb[216].mxu0 }
 0x72f   :  { %v4229_v2 = vadd.f32 %v5285_v15, %v3112_v36  ;;  %v3114_v28 = vpop.f32.mrb[217].mxu0  ;;  %3887 = vmatprep.subr.bf16.mxu1 %v3217_v33 }
 0x730   :  { %v3115_v3 = vpop.f32.mrb[218].mxu0  ;;  %3888 = vmatpush3.bf16.msra.mxu1 %v5378_v52  ;;  %v4735_v52 = vld [vmem:[%s5496_s7 + $0x10] sm:$0xff]  }
 0x731   :  { %v4230_v4 = vadd.f32 %v5285_v15, %v3115_v3  ;;  %v3117_v6 = vpop.f32.mrb[219].mxu0  ;;  %v3181_v8 = vmax.f32 %v4229_v2, 0.0  ;;  %v4734_v15 = vld [vmem:[%s5496_s7 + $0x8] sm:$0xff]  }
 0x733   :  { %v3182_v9 = vmax.f32 %v4230_v4, 0.0 }
 0x735   :  { %v3218_v43 = vpack.c.bf16 %v3182_v9, %v3181_v8 }
 0x737   :  { %3889 = vmatprep.subr.bf16.mxu1 %v3218_v43 }
 0x738   :  { %3890 = vmatpush3.bf16.msra.mxu1 %v5382_v62  ;;  %v4736_v62 = vld [vmem:[%s5496_s7 + $0x18] sm:$0xff]  }
 0x739   :  { %4061 = vmatprep.subr.bf16.mxu1 %v4905_v39 }
 0x73b   :  { %3313 = vmatmul.mubr.bf16.vlgmr.msra.gmra.mrb[168].mxu1 %v4730_v10 }
 0x73c   :  { %4062 = vmatpush3.bf16.msra.mxu1 %v4733_v11  ;;  %4077 = vmatprep.mubr.msk.bf16.mxu1 %vm4906_vm2, %v4905_v39 }
 0x73d   :  { %4063 = vmatprep.subr.bf16.mxu1 %v4905_v39 }
 0x740   :  { %4064 = vmatpush3.bf16.msra.mxu1 %v4734_v15 }
 0x741   :  { %4065 = vmatprep.subr.bf16.mxu1 %v4905_v39 }
 0x744   :  { %4066 = vmatpush3.bf16.msra.mxu1 %v4735_v52 }
 0x745   :  { %4067 = vmatprep.subr.bf16.mxu1 %v4905_v39 }
 0x748   :  { %4068 = vmatpush3.bf16.msra.mxu1 %v4736_v62 }
 0x749   :  { %4069 = vmatprep.subr.bf16.mxu1 %v4905_v39 }
 0x74c   :  { %4070 = vmatpush3.bf16.msra.mxu1 %v4737_v5 }
 0x74d   :  { %4071 = vmatprep.subr.bf16.mxu1 %v4905_v39 }
 0x750   :  { %4072 = vmatpush3.bf16.msra.mxu1 %v4738_v13 }
 0x751   :  { %4073 = vmatprep.subr.bf16.mxu1 %v4905_v39 }
 0x754   :  { %4074 = vmatpush3.bf16.msra.mxu1 %v4739_v18 }
 0x755   :  { %4075 = vmatprep.subr.bf16.mxu1 %v4905_v39 }
 0x758   :  { %4076 = vmatpush3.bf16.msra.mxu1 %v4740_v24 }
 0x759   :  { %4081 = vmatprep.subr.bf16.mxu1 %v4905_v39 }
 0x78e   :  { %v3869_v14 = vpop.f32.mrb[164].mxu1 }
 0x78f   :  { %v3870_v17 = vpop.f32.mrb[165].mxu1 }
 0x790   :  { %v3871_v19 = vadd.f32 %v3870_v17, %v3869_v14  ;;  %v3872_v20 = vpop.f32.mrb[166].mxu1 }
 0x791   :  { %v3873_v50 = vpop.f32.mrb[167].mxu1 }
 0x792   :  { %v3874_v21 = vadd.f32 %v3873_v50, %v3872_v20 }
 0x80e   :  { %v3891_v25 = vpop.f32.mrb[168].mxu1 }
 0x80f   :  { %v3892_v27 = vpop.f32.mrb[169].mxu1 }
 0x810   :  { %v3893_v60 = vadd.f32 %v3892_v27, %v3891_v25  ;;  %v3894_v29 = vpop.f32.mrb[170].mxu1 }
 0x811   :  { %v3895_v30 = vpop.f32.mrb[171].mxu1 }
 0x812   :  { %v3315_v31 = vadd.f32 %v3893_v60, %v3871_v19  ;;  %v3896_v61 = vadd.f32 %v3895_v30, %v3894_v29 }
 0x814   :  { %v3318_v32 = vadd.f32 %v3896_v61, %v3874_v21 }
 0x816   :  { %v3321_v35 = vpack.c.bf16 %v3318_v32, %v3315_v31 }
 0x818   :  { %4078 = vmatmul.mubr.bf16.vlgmr.msra.gmra.mrb[172].mxu1 %v3321_v35 }
 0x819   :  { %4082 = vmatpush3.bf16.msra.mxu1 %v4741_v34  ;;  %4097 = vmatprep.mubr.msk.bf16.mxu1 %vm4906_vm2, %v4905_v39 }
 0x81a   :  { %4083 = vmatprep.subr.bf16.mxu1 %v4905_v39 }
 0x81d   :  { %4084 = vmatpush3.bf16.msra.mxu1 %v4742_v37 }
 0x81e   :  { %4085 = vmatprep.subr.bf16.mxu1 %v4905_v39 }
 0x821   :  { %4086 = vmatpush3.bf16.msra.mxu1 %v4743_v22 }
 0x822   :  { %4087 = vmatprep.subr.bf16.mxu1 %v4905_v39 }
 0x825   :  { %4088 = vmatpush3.bf16.msra.mxu1 %v4744_v38 }
 0x826   :  { %4089 = vmatprep.subr.bf16.mxu1 %v4905_v39 }
 0x829   :  { %4090 = vmatpush3.bf16.msra.mxu1 %v4745_v40 }
 0x82a   :  { %4091 = vmatprep.subr.bf16.mxu1 %v4905_v39 }
 0x82d   :  { %4092 = vmatpush3.bf16.msra.mxu1 %v4746_v41 }
 0x82e   :  { %4093 = vmatprep.subr.bf16.mxu1 %v4905_v39 }
 0x831   :  { %4094 = vmatpush3.bf16.msra.mxu1 %v4747_v7 }
 0x832   :  { %4095 = vmatprep.subr.bf16.mxu1 %v4905_v39 }
 0x835   :  { %4096 = vmatpush3.bf16.msra.mxu1 %v4748_v42 }
 0x8eb   :  { %v3427_v45 = vpop.f32.mrb[172].mxu1 }
 0x8ec   :  { %v3428_v46 = vadd.f32 %v3762_v44, %v3427_v45  ;;  %v4079_v12 = vpop.f32.mrb[173].mxu1 }
 0x8ed   :  { %v3430_v47 = vpop.f32.mrb[174].mxu1 }
 0x8ee   :  { %v3431_v48 = vadd.f32 %v3762_v44, %v3430_v47  ;;  %v4080_v49 = vpop.f32.mrb[175].mxu1  ;;  %v3434_v16 = vmax.f32 %v3428_v46, 0.0 }
 0x8f0   :  { %v3435_v51 = vmax.f32 %v3431_v48, 0.0 }
 0x8f2   :  { %v3436_v53 = vpack.c.bf16 %v3435_v51, %v3434_v16 }
 0x8f4   :  { %4098 = vmatmul.mubr.bf16.vlgmr.msra.gmra.mrb[176].mxu1 %v3436_v53 }
 0x9c7   :  { %v3542_v55 = vpop.f32.mrb[176].mxu1 }
 0x9c8   :  { %v3543_v23 = vadd.f32 %v3771_v54, %v3542_v55  ;;  %v4099_v26 = vpop.f32.mrb[177].mxu1 }
 0x9c9   :  { %v3545_v56 = vpop.f32.mrb[178].mxu1 }
 0x9ca   :  { %3549 = vst [vmem:[%s5500_s11] sm:$0xff] %v3543_v23  ;;  %v3546_v57 = vadd.f32 %v3771_v54, %v3545_v56  ;;  %v4100_v58 = vpop.f32.mrb[179].mxu1 }
 0x9cc   :  { %3550 = vst [vmem:[%s5500_s11 + $0x8] sm:$0xff] %v3546_v57 }
 0x9cd   :  { %3555 = vsyncpa [#allocation3], 1 }

</bundles_post_ra>
